<compile_context>
chip_gen: v6e
topology: v6e:2x2x1
jax: 0.10.0
libtpu: 0.0.40
codegen_flags: <defaults>
</compile_context>

<pallas_src>
import functools

import jax
import jax.numpy as jnp
import numpy as np
from jax import lax
from jax.experimental import pallas as pl
from jax.experimental.pallas import tpu as pltpu

EMB = 512           # embedding width (fixed by the module: Linear(512, ...))
LRELU_SLOPE = 0.01  # torch.nn.LeakyReLU default
EPS = 1e-5          # InstanceNorm2d / LayerNorm default eps


# ----------------------------------------------------------------------------
# Kernel A: gamma/beta MLPs
#   gamma = exp(Linear -> LayerNorm -> LeakyReLU -> Linear)(emb)
#   beta  =     (Linear -> LayerNorm -> LeakyReLU -> Linear)(emb)
# First layers of both branches are fused into a single (512, 1024) matmul.
# ----------------------------------------------------------------------------
def modulation_mlp_kernel(emb_ref, w1_ref, b1_ref,
                          lng_w_ref, lng_b_ref, lnb_w_ref, lnb_b_ref,
                          w2g_ref, b2g_ref, w2b_ref, b2b_ref,
                          gamma_ref, beta_ref):
    emb = emb_ref[...]                                              # (B, 512)
    h = jnp.dot(emb, w1_ref[...],
                preferred_element_type=jnp.float32) + b1_ref[...]   # (B, 1024)

    def ln_lrelu(v, w_ref, b_ref):
        mu = jnp.mean(v, axis=-1, keepdims=True)
        var = jnp.mean((v - mu) ** 2, axis=-1, keepdims=True)
        v = (v - mu) * lax.rsqrt(var + EPS) * w_ref[...] + b_ref[...]
        return jnp.where(v >= 0, v, LRELU_SLOPE * v)

    hg = ln_lrelu(h[:, :EMB], lng_w_ref, lng_b_ref)                 # (B, 512)
    hb = ln_lrelu(h[:, EMB:], lnb_w_ref, lnb_b_ref)                 # (B, 512)

    log_gamma = jnp.dot(hg, w2g_ref[...],
                        preferred_element_type=jnp.float32) + b2g_ref[...]
    gamma_ref[...] = jnp.exp(log_gamma)
    beta_ref[...] = jnp.dot(hb, w2b_ref[...],
                            preferred_element_type=jnp.float32) + b2b_ref[...]


# ----------------------------------------------------------------------------
# Kernel B: conv3x3 (no bias, zero-pad "same") + InstanceNorm2d + FiLM
#           modulation + LeakyReLU, fused.
#   - taps for the whole batch tile built by 8 batched rolls into a VMEM scratch
#   - one (C, 9C) @ (9C, bt*HW) MXU matmul per grid step
#   - InstanceNorm + FiLM folded into a single per-channel affine
# ----------------------------------------------------------------------------
def conv_mod_kernel(x_ref, w_ref, gamma_ref, beta_ref, out_ref, taps_ref,
                    *, H, W):
    bt, C, HW = x_ref.shape
    N = bt * HW
    CENTER = 4                      # tap index of (dh, dw) == (0, 0)
    taps_dtype = taps_ref.dtype

    # --- Stage x into the centre-tap rows of the tap matrix -----------------
    # (bt, C, HW) -> (C, bt*HW) done purely by placement: aligned lane-dense
    # (C, HW) stores per batch element, cast to the MXU dtype on the way.
    for b in range(bt):
        taps_ref[pl.ds(CENTER * C, C), pl.ds(b * HW, HW)] = (
            x_ref[b].astype(taps_dtype))

    xt = taps_ref[pl.ds(CENTER * C, C), :]                  # (C, bt*HW)

    # --- Remaining 8 taps: one batched roll + one mask per tap --------------
    pos = lax.broadcasted_iota(jnp.int32, (1, N), 1)
    col = pos % W
    row = (pos // W) % H

    for kh in range(3):
        for kw in range(3):
            t = kh * 3 + kw
            if t == CENTER:
                continue
            dh, dw = kh - 1, kw - 1
            # Roll over the fully flattened batch-tile; shift taken mod N so
            # every in-bounds position still sources from its own image, and
            # any cross-image wrap lands only on halo-masked positions.
            v = pltpu.roll(xt, shift=(-(dh * W + dw)) % N, axis=1)
            conds = []
            if dh < 0:
                conds.append(row >= -dh)
            if dh > 0:
                conds.append(row < H - dh)
            if dw < 0:
                conds.append(col >= -dw)
            if dw > 0:
                conds.append(col < W - dw)
            mask = conds[0]
            for c in conds[1:]:
                mask = mask & c
            v = jnp.where(mask, v, jnp.zeros_like(v))       # zero-pad halo
            taps_ref[pl.ds(t * C, C), :] = v

    # --- Single im2col matmul for the whole batch tile ----------------------
    # (C, 9C) @ (9C, bt*HW) -> (C, bt*HW), f32 accumulation on the MXU.
    conv = jnp.dot(w_ref[...], taps_ref[...],
                   preferred_element_type=jnp.float32)

    # --- InstanceNorm2d + FiLM folded into one per-channel affine -----------
    # (stats + elementwise per batch element: no amortization available, the
    #  slices are lane-tile aligned so they are plain sub-vreg selections)
    inv_hw = 1.0 / HW
    for b in range(bt):
        seg = conv[:, b * HW:(b + 1) * HW]                  # (C, HW)
        mu = jnp.sum(seg, axis=1, keepdims=True) * inv_hw
        ex2 = jnp.sum(seg * seg, axis=1, keepdims=True) * inv_hw
        var = ex2 - mu * mu                                 # biased, f32
        g = gamma_ref[0, :, b:b + 1]                        # (C, 1)
        bet = beta_ref[0, :, b:b + 1]                       # (C, 1)
        scale = (1.0 + g) * lax.rsqrt(var + EPS)
        shift = bet - mu * scale
        y = seg * scale + shift
        out_ref[b] = jnp.where(y >= 0, y, LRELU_SLOPE * y)


# ----------------------------------------------------------------------------
# VMEM budgeting (generation-aware)
# ----------------------------------------------------------------------------
def _vmem_capacity_bytes():
    try:
        info = pltpu.get_tpu_info()
        cap = getattr(info, "vmem_capacity_bytes", None)
        if cap:
            return int(cap)
    except Exception:
        pass
    return 64 << 20   # conservative fallback (v7x per-core physical)


def _per_step_vmem_bytes(bt, C, HW, mxu_bytes):
    x_blk = bt * C * HW * 4 * 2            # f32 input block, double-buffered
    out_blk = bt * C * HW * 4 * 2          # f32 output block, double-buffered
    taps = 9 * C * bt * HW * mxu_bytes     # tap scratch (single buffer)
    conv_tmp = bt * C * HW * 4 * 2         # f32 conv value + epilogue temps
    weight = C * 9 * C * mxu_bytes * 2     # resident weight, double-buffered
    small = 16 * C * bt                    # gamma/beta blocks, misc
    return x_blk + out_blk + taps + conv_tmp + weight + small


def _choose_batch_tile(B, C, HW, mxu_bytes, vmem_cap):
    """Largest batch tile that fits ~40% of physical VMEM, but keep >= 2 grid
    steps when B > 1 so both v7x TensorCores get work."""
    budget = int(vmem_cap * 0.4)
    bt = B
    while bt > 1 and _per_step_vmem_bytes(bt, C, HW, mxu_bytes) > budget:
        bt -= 1
    if B > 1:
        bt = min(bt, pl.cdiv(B, 2))
    while B % bt:
        bt -= 1
    return max(bt, 1)


# ----------------------------------------------------------------------------
# Wrapper
# ----------------------------------------------------------------------------
def text_modulation_forward(x_nchw, embedding, params, *, batch_tile=None,
                            use_bf16_mxu=True):
    """x_nchw: (B, C, H, W) fp32; embedding: (B, 512). Returns (B, C, H, W)."""
    B, C, H, W = x_nchw.shape
    HW = H * W
    assert HW % 128 == 0, "H*W must be a multiple of 128 for lane-dense layout"

    mxu_dtype = jnp.bfloat16 if use_bf16_mxu else jnp.float32
    mxu_bytes = 2 if use_bf16_mxu else 4

    # Free reshape: NCHW -> (B, C, H*W). No transpose, no pad (conv halo is
    # handled in-kernel); x stays f32 in HBM (single read), bf16 cast happens
    # during the in-kernel staging store.
    x = x_nchw.reshape(B, C, HW).astype(jnp.float32)
    emb = embedding.astype(jnp.float32)

    # ---- Kernel A: gamma / beta for every batch element --------------------
    w1 = jnp.concatenate([params["w1g"], params["w1b"]], axis=1)    # (512,1024)
    b1 = jnp.concatenate([params["b1g"], params["b1b"]], axis=1)    # (1, 1024)
    gamma, beta = pl.pallas_call(
        modulation_mlp_kernel,
        out_shape=(jax.ShapeDtypeStruct((B, C), jnp.float32),
                   jax.ShapeDtypeStruct((B, C), jnp.float32)),
    )(emb, w1, b1,
      params["lng_w"], params["lng_b"], params["lnb_w"], params["lnb_b"],
      params["w2g"], params["b2g"], params["w2b"], params["b2b"])

    # ---- Kernel B: fused conv3x3 + InstanceNorm + FiLM + LeakyReLU ----------
    vmem_cap = _vmem_capacity_bytes()
    bt = (batch_tile if batch_tile is not None
          else _choose_batch_tile(B, C, HW, mxu_bytes, vmem_cap))
    assert B % bt == 0
    nb = B // bt
    vmem_limit = int(min(0.9 * vmem_cap,
                         max(2 * _per_step_vmem_bytes(bt, C, HW, mxu_bytes),
                             32 << 20)))

    # Channel-major modulation params tiled per grid step: (nb, C, bt).
    # (tiny arrays; (C, 1) broadcast shape is what the kernel needs)
    gamma_t = gamma.T.reshape(C, nb, bt).transpose(1, 0, 2)
    beta_t = beta.T.reshape(C, nb, bt).transpose(1, 0, 2)

    # Conv weight (C_out, C_in, 3, 3) -> (C_out, 9*C_in), tap-major, cast to
    # the MXU operand dtype once in the wrapper.
    w_flat = jnp.transpose(params["conv_w"], (0, 2, 3, 1)).reshape(
        C, 9 * C).astype(mxu_dtype)

    kernel = functools.partial(conv_mod_kernel, H=H, W=W)
    out = pl.pallas_call(
        kernel,
        out_shape=jax.ShapeDtypeStruct((B, C, HW), jnp.float32),
        grid_spec=pltpu.PrefetchScalarGridSpec(
            num_scalar_prefetch=0,
            grid=(nb,),
            in_specs=[
                pl.BlockSpec((bt, C, HW), lambda t: (t, 0, 0)),   # x tile
                # constant index_map -> fetched once, not re-DMA'd per step
                pl.BlockSpec((C, 9 * C), lambda t: (0, 0)),       # conv weight
                pl.BlockSpec((1, C, bt), lambda t: (t, 0, 0)),    # gamma tile
                pl.BlockSpec((1, C, bt), lambda t: (t, 0, 0)),    # beta tile
            ],
            out_specs=pl.BlockSpec((bt, C, HW), lambda t: (t, 0, 0)),
            scratch_shapes=[pltpu.VMEM((9 * C, bt * HW), mxu_dtype)],
        ),
        compiler_params=pltpu.CompilerParams(
            dimension_semantics=("parallel",),
            vmem_limit_bytes=vmem_limit),
    )(x, w_flat, gamma_t, beta_t)

    return out.reshape(B, C, H, W)      # free reshape back to NCHW


# ----------------------------------------------------------------------------
# Pure-JAX reference (for correctness check)
# ----------------------------------------------------------------------------
def reference_forward(x_nchw, embedding, params):
    conv = lax.conv_general_dilated(
        x_nchw, params["conv_w"], window_strides=(1, 1), padding="SAME",
        dimension_numbers=("NCHW", "OIHW", "NCHW"))
    mu = conv.mean(axis=(2, 3), keepdims=True)
    var = conv.var(axis=(2, 3), keepdims=True)
    xn = (conv - mu) / jnp.sqrt(var + EPS)

    def mlp(e, w1, b1, lw, lb, w2, b2):
        h = e @ w1 + b1
        m = h.mean(-1, keepdims=True)
        v = h.var(-1, keepdims=True)
        h = (h - m) / jnp.sqrt(v + EPS) * lw + lb
        h = jnp.where(h >= 0, h, LRELU_SLOPE * h)
        return h @ w2 + b2

    log_gamma = mlp(embedding, params["w1g"], params["b1g"],
                    params["lng_w"], params["lng_b"],
                    params["w2g"], params["b2g"])
    gamma = jnp.exp(log_gamma)[:, :, None, None]
    beta = mlp(embedding, params["w1b"], params["b1b"],
               params["lnb_w"], params["lnb_b"],
               params["w2b"], params["b2b"])[:, :, None, None]
    out = xn * (1.0 + gamma) + beta
    return jnp.where(out >= 0, out, LRELU_SLOPE * out)


def init_params(key, C):
    ks = jax.random.split(key, 8)
    return {
        # Conv2d(C, C, 3, padding=1, bias=False): weight (C_out, C_in, 3, 3)
        "conv_w": 0.1 * jax.random.normal(ks[0], (C, C, 3, 3), jnp.float32),
        # gamma branch: Linear(512,512), LayerNorm(512), Linear(512, C)
        "w1g": 0.02 * jax.random.normal(ks[1], (EMB, EMB), jnp.float32),
        "b1g": 0.01 * jax.random.normal(ks[2], (1, EMB), jnp.float32),
        "lng_w": jnp.ones((1, EMB), jnp.float32),
        "lng_b": jnp.zeros((1, EMB), jnp.float32),
        "w2g": 0.02 * jax.random.normal(ks[3], (EMB, C), jnp.float32),
        "b2g": 0.01 * jax.random.normal(ks[4], (1, C), jnp.float32),
        # beta branch
        "w1b": 0.02 * jax.random.normal(ks[5], (EMB, EMB), jnp.float32),
        "b1b": 0.01 * jax.random.normal(ks[6], (1, EMB), jnp.float32),
        "lnb_w": jnp.ones((1, EMB), jnp.float32),
        "lnb_b": jnp.zeros((1, EMB), jnp.float32),
        "w2b": 0.02 * jax.random.normal(ks[7], (EMB, C), jnp.float32),
        "b2b": jnp.zeros((1, C), jnp.float32),
    }


if __name__ == "__main__":
    B, C, H, W = 2, 8, 16, 16
    key = jax.random.PRNGKey(0)
    kx, ke, kp = jax.random.split(key, 3)

    x = jax.random.normal(kx, (B, C, H, W), jnp.float32)
    emb = jax.random.normal(ke, (B, EMB), jnp.float32)
    params = init_params(kp, C)

    ref = jax.block_until_ready(reference_forward(x, emb, params))

    # Exact f32 MXU path: tight check.
    out_f32 = jax.block_until_ready(
        text_modulation_forward(x, emb, params, use_bf16_mxu=False))
    assert out_f32.shape == (B, C, H, W), out_f32.shape
    np.testing.assert_allclose(np.asarray(out_f32), np.asarray(ref),
                               rtol=1e-4, atol=1e-4)

    # Default bf16-MXU fast path (f32 accumulate): looser check.
    out_bf16 = jax.block_until_ready(text_modulation_forward(x, emb, params))
    np.testing.assert_allclose(np.asarray(out_bf16), np.asarray(ref),
                               rtol=5e-2, atol=5e-2)

    print("KERNEL_OK")
</pallas_src>

<mosaic_0001>
module attributes {stable_mosaic.version = 11 : i64} {
  func.func @modulation_mlp_kernel(%arg0: memref<2x512xf32, #tpu.memory_space<vmem>>, %arg1: memref<512x1024xf32, #tpu.memory_space<vmem>>, %arg2: memref<1x1024xf32, #tpu.memory_space<vmem>>, %arg3: memref<1x512xf32, #tpu.memory_space<vmem>>, %arg4: memref<1x512xf32, #tpu.memory_space<vmem>>, %arg5: memref<1x512xf32, #tpu.memory_space<vmem>>, %arg6: memref<1x512xf32, #tpu.memory_space<vmem>>, %arg7: memref<512x8xf32, #tpu.memory_space<vmem>>, %arg8: memref<1x8xf32, #tpu.memory_space<vmem>>, %arg9: memref<512x8xf32, #tpu.memory_space<vmem>>, %arg10: memref<1x8xf32, #tpu.memory_space<vmem>>, %arg11: memref<2x8xf32, #tpu.memory_space<vmem>>, %arg12: memref<2x8xf32, #tpu.memory_space<vmem>>) attributes {dimension_semantics = [], scalar_prefetch = 0 : i64, scratch_operands = 0 : i64, tpu.core_type = #tpu.core_type<tc>} {
    %c0 = arith.constant 0 : index
    %c0_0 = arith.constant 0 : index
    %0 = vector.load %arg0[%c0, %c0_0] : memref<2x512xf32, #tpu.memory_space<vmem>>, vector<2x512xf32>
    %c0_1 = arith.constant 0 : index
    %c0_2 = arith.constant 0 : index
    %1 = vector.load %arg1[%c0_1, %c0_2] : memref<512x1024xf32, #tpu.memory_space<vmem>>, vector<512x1024xf32>
    %cst = arith.constant dense<0.000000e+00> : vector<2x1024xf32>
    %2 = tpu.matmul %0, %1, %cst {dimension_numbers = #tpu.dot_dimension_numbers<[1], [0], [0], [1], [0, 0, 1, 1], [], []>} : vector<2x512xf32>, vector<512x1024xf32>, vector<2x1024xf32> -> vector<2x1024xf32>
    %c0_3 = arith.constant 0 : index
    %c0_4 = arith.constant 0 : index
    %3 = vector.load %arg2[%c0_3, %c0_4] : memref<1x1024xf32, #tpu.memory_space<vmem>>, vector<1x1024xf32>
    %4 = vector.broadcast %3 : vector<1x1024xf32> to vector<2x1024xf32>
    %5 = arith.addf %2, %4 : vector<2x1024xf32>
    %6 = vector.extract_strided_slice %5 {offsets = [0, 0], sizes = [2, 512], strides = [1, 1]} : vector<2x1024xf32> to vector<2x512xf32>
    %cst_5 = arith.constant dense<0.000000e+00> : vector<2xf32>
    %7 = vector.multi_reduction <add>, %6, %cst_5 [1] : vector<2x512xf32> to vector<2xf32>
    %8 = vector.shape_cast %7 : vector<2xf32> to vector<2x1xf32>
    %cst_6 = arith.constant 5.120000e+02 : f32
    %9 = vector.broadcast %cst_6 : f32 to vector<2x1xf32>
    %10 = arith.divf %8, %9 : vector<2x1xf32>
    %11 = vector.broadcast %10 : vector<2x1xf32> to vector<2x512xf32>
    %12 = arith.subf %6, %11 : vector<2x512xf32>
    %13 = arith.mulf %12, %12 : vector<2x512xf32>
    %cst_7 = arith.constant dense<0.000000e+00> : vector<2xf32>
    %14 = vector.multi_reduction <add>, %13, %cst_7 [1] : vector<2x512xf32> to vector<2xf32>
    %15 = vector.shape_cast %14 : vector<2xf32> to vector<2x1xf32>
    %cst_8 = arith.constant 5.120000e+02 : f32
    %16 = vector.broadcast %cst_8 : f32 to vector<2x1xf32>
    %17 = arith.divf %15, %16 : vector<2x1xf32>
    %18 = vector.broadcast %10 : vector<2x1xf32> to vector<2x512xf32>
    %19 = arith.subf %6, %18 : vector<2x512xf32>
    %cst_9 = arith.constant 9.99999974E-6 : f32
    %20 = vector.broadcast %cst_9 : f32 to vector<2x1xf32>
    %21 = arith.addf %17, %20 : vector<2x1xf32>
    %22 = math.rsqrt %21 : vector<2x1xf32>
    %23 = vector.broadcast %22 : vector<2x1xf32> to vector<2x512xf32>
    %24 = arith.mulf %19, %23 : vector<2x512xf32>
    %c0_10 = arith.constant 0 : index
    %c0_11 = arith.constant 0 : index
    %25 = vector.load %arg3[%c0_10, %c0_11] : memref<1x512xf32, #tpu.memory_space<vmem>>, vector<1x512xf32>
    %26 = vector.broadcast %25 : vector<1x512xf32> to vector<2x512xf32>
    %27 = arith.mulf %24, %26 : vector<2x512xf32>
    %c0_12 = arith.constant 0 : index
    %c0_13 = arith.constant 0 : index
    %28 = vector.load %arg4[%c0_12, %c0_13] : memref<1x512xf32, #tpu.memory_space<vmem>>, vector<1x512xf32>
    %29 = vector.broadcast %28 : vector<1x512xf32> to vector<2x512xf32>
    %30 = arith.addf %27, %29 : vector<2x512xf32>
    %cst_14 = arith.constant 0.000000e+00 : f32
    %31 = vector.broadcast %cst_14 : f32 to vector<2x512xf32>
    %32 = arith.cmpf oge, %30, %31 : vector<2x512xf32>
    %cst_15 = arith.constant 0.00999999977 : f32
    %33 = vector.broadcast %cst_15 : f32 to vector<2x512xf32>
    %34 = arith.mulf %33, %30 : vector<2x512xf32>
    %35 = arith.select %32, %30, %34 : vector<2x512xi1>, vector<2x512xf32>
    %36 = vector.extract_strided_slice %5 {offsets = [0, 512], sizes = [2, 512], strides = [1, 1]} : vector<2x1024xf32> to vector<2x512xf32>
    %cst_16 = arith.constant dense<0.000000e+00> : vector<2xf32>
    %37 = vector.multi_reduction <add>, %36, %cst_16 [1] : vector<2x512xf32> to vector<2xf32>
    %38 = vector.shape_cast %37 : vector<2xf32> to vector<2x1xf32>
    %cst_17 = arith.constant 5.120000e+02 : f32
    %39 = vector.broadcast %cst_17 : f32 to vector<2x1xf32>
    %40 = arith.divf %38, %39 : vector<2x1xf32>
    %41 = vector.broadcast %40 : vector<2x1xf32> to vector<2x512xf32>
    %42 = arith.subf %36, %41 : vector<2x512xf32>
    %43 = arith.mulf %42, %42 : vector<2x512xf32>
    %cst_18 = arith.constant dense<0.000000e+00> : vector<2xf32>
    %44 = vector.multi_reduction <add>, %43, %cst_18 [1] : vector<2x512xf32> to vector<2xf32>
    %45 = vector.shape_cast %44 : vector<2xf32> to vector<2x1xf32>
    %cst_19 = arith.constant 5.120000e+02 : f32
    %46 = vector.broadcast %cst_19 : f32 to vector<2x1xf32>
    %47 = arith.divf %45, %46 : vector<2x1xf32>
    %48 = vector.broadcast %40 : vector<2x1xf32> to vector<2x512xf32>
    %49 = arith.subf %36, %48 : vector<2x512xf32>
    %cst_20 = arith.constant 9.99999974E-6 : f32
    %50 = vector.broadcast %cst_20 : f32 to vector<2x1xf32>
    %51 = arith.addf %47, %50 : vector<2x1xf32>
    %52 = math.rsqrt %51 : vector<2x1xf32>
    %53 = vector.broadcast %52 : vector<2x1xf32> to vector<2x512xf32>
    %54 = arith.mulf %49, %53 : vector<2x512xf32>
    %c0_21 = arith.constant 0 : index
    %c0_22 = arith.constant 0 : index
    %55 = vector.load %arg5[%c0_21, %c0_22] : memref<1x512xf32, #tpu.memory_space<vmem>>, vector<1x512xf32>
    %56 = vector.broadcast %55 : vector<1x512xf32> to vector<2x512xf32>
    %57 = arith.mulf %54, %56 : vector<2x512xf32>
    %c0_23 = arith.constant 0 : index
    %c0_24 = arith.constant 0 : index
    %58 = vector.load %arg6[%c0_23, %c0_24] : memref<1x512xf32, #tpu.memory_space<vmem>>, vector<1x512xf32>
    %59 = vector.broadcast %58 : vector<1x512xf32> to vector<2x512xf32>
    %60 = arith.addf %57, %59 : vector<2x512xf32>
    %cst_25 = arith.constant 0.000000e+00 : f32
    %61 = vector.broadcast %cst_25 : f32 to vector<2x512xf32>
    %62 = arith.cmpf oge, %60, %61 : vector<2x512xf32>
    %cst_26 = arith.constant 0.00999999977 : f32
    %63 = vector.broadcast %cst_26 : f32 to vector<2x512xf32>
    %64 = arith.mulf %63, %60 : vector<2x512xf32>
    %65 = arith.select %62, %60, %64 : vector<2x512xi1>, vector<2x512xf32>
    %c0_27 = arith.constant 0 : index
    %c0_28 = arith.constant 0 : index
    %66 = vector.load %arg7[%c0_27, %c0_28] : memref<512x8xf32, #tpu.memory_space<vmem>>, vector<512x8xf32>
    %cst_29 = arith.constant dense<0.000000e+00> : vector<2x8xf32>
    %67 = tpu.matmul %35, %66, %cst_29 {dimension_numbers = #tpu.dot_dimension_numbers<[1], [0], [0], [1], [0, 0, 1, 1], [], []>} : vector<2x512xf32>, vector<512x8xf32>, vector<2x8xf32> -> vector<2x8xf32>
    %c0_30 = arith.constant 0 : index
    %c0_31 = arith.constant 0 : index
    %68 = vector.load %arg8[%c0_30, %c0_31] : memref<1x8xf32, #tpu.memory_space<vmem>>, vector<1x8xf32>
    %69 = vector.broadcast %68 : vector<1x8xf32> to vector<2x8xf32>
    %70 = arith.addf %67, %69 : vector<2x8xf32>
    %71 = math.exp %70 : vector<2x8xf32>
    %c0_32 = arith.constant 0 : index
    %c0_33 = arith.constant 0 : index
    %72 = vector.load %arg11[%c0_32, %c0_33] : memref<2x8xf32, #tpu.memory_space<vmem>>, vector<2x8xf32>
    tpu.vector_store %arg11[%c0_32, %c0_33], %71 {strides = array<i32>} : memref<2x8xf32, #tpu.memory_space<vmem>>, vector<2x8xf32>,
    %c0_34 = arith.constant 0 : index
    %c0_35 = arith.constant 0 : index
    %73 = vector.load %arg9[%c0_34, %c0_35] : memref<512x8xf32, #tpu.memory_space<vmem>>, vector<512x8xf32>
    %cst_36 = arith.constant dense<0.000000e+00> : vector<2x8xf32>
    %74 = tpu.matmul %65, %73, %cst_36 {dimension_numbers = #tpu.dot_dimension_numbers<[1], [0], [0], [1], [0, 0, 1, 1], [], []>} : vector<2x512xf32>, vector<512x8xf32>, vector<2x8xf32> -> vector<2x8xf32>
    %c0_37 = arith.constant 0 : index
    %c0_38 = arith.constant 0 : index
    %75 = vector.load %arg10[%c0_37, %c0_38] : memref<1x8xf32, #tpu.memory_space<vmem>>, vector<1x8xf32>
    %76 = vector.broadcast %75 : vector<1x8xf32> to vector<2x8xf32>
    %77 = arith.addf %74, %76 : vector<2x8xf32>
    %c0_39 = arith.constant 0 : index
    %c0_40 = arith.constant 0 : index
    %78 = vector.load %arg12[%c0_39, %c0_40] : memref<2x8xf32, #tpu.memory_space<vmem>>, vector<2x8xf32>
    tpu.vector_store %arg12[%c0_39, %c0_40], %77 {strides = array<i32>} : memref<2x8xf32, #tpu.memory_space<vmem>>, vector<2x8xf32>,
    return
  }
}

</mosaic_0001>

<bundles_post_ra>
// kernel: tpu_custom_call.1
= control target key start
LH: loop header
LB: loop body
LE: loop exit
PB: predicated region body
PF: predicated region fallthrough
CT: control target
= control target key end

     0   :  { %18 = vsyncpa [#allocation3], 0  ;;  %s2985_s0 = inlined_call_operand.hbm [shape: f32[2,512], index: 0, kind: input, shape index: {}]   ;;  %s2986_s1 = inlined_call_operand.hbm [shape: f32[512,1024], index: 1, kind: input, shape index: {}]   ;;  %s2987_s2 = inlined_call_operand.hbm [shape: f32[1,1024], index: 2, kind: input, shape index: {}]   ;;  %s2988_s3 = inlined_call_operand.hbm [shape: f32[1,512], index: 3, kind: input, shape index: {}]   ;;  %s2989_s4 = inlined_call_operand.hbm [shape: f32[1,512], index: 4, kind: input, shape index: {}]   ;;  %s2990_s5 = inlined_call_operand.hbm [shape: f32[1,512], index: 5, kind: input, shape index: {}]   ;;  %s2991_s6 = inlined_call_operand.hbm [shape: f32[1,512], index: 6, kind: input, shape index: {}]   ;;  %s2992_s7 = inlined_call_operand.vmem [shape: f32[512,8], index: 7, kind: input, shape index: {}]   ;;  %s2993_s8 = inlined_call_operand.hbm [shape: f32[1,8], index: 8, kind: input, shape index: {}]   ;;  %s2994_s9 = inlined_call_operand.vmem [shape: f32[512,8], index: 9, kind: input, shape index: {}]   ;;  %s2995_s10 = inlined_call_operand.hbm [shape: f32[1,8], index: 10, kind: input, shape index: {}]   ;;  %s2996_s11 = inlined_call_operand.hbm [shape: f32[2,8], index: 11, kind: output, shape index: {0}]   ;;  %s2997_s12 = inlined_call_operand.hbm [shape: f32[2,8], index: 12, kind: output, shape index: {1}]  }
   0x1   :  { %19 = vsyncpa [#allocation6], 0 }
   0x2   :  { %20 = vsyncpa [#allocation9], 0 }
   0x3   :  { %21 = vsyncpa [#allocation12], 0 }
   0x4   :  { %22 = vsyncpa [#allocation15], 0 }
   0x5   :  { %23 = vsyncpa [#allocation4], 0 }
   0x6   :  { %24 = vsyncpa [#allocation19], 0  ;;  %s2348_s21 = smov [#allocation5]  }
   0x7   :  { %s40_s22 = sshll.u32 %s2348_s21, 4  ;;  %s41_s22 = int_to_ptr.vmem [resolvable:$true] %s40_s22 }
   0x8   :  { %s2122_s23 = scalar_lea.vmem %s41_s22, 65536  ;;  %p2127_p1 = scmp.lt.s32.totalorder %s41_s22, %s41_s22 }
   0x9   :  { %p2123_p0 = scmp.ne.s32.totalorder %s41_s22, %s2122_s23  ;;  %p2128_p2 = scmp.lt.s32.totalorder %s2122_s23, %s2122_s23 }
   0xb   :  { %p2129_p3 = por %p2128_p2, %p2127_p1 }
   0xd   :  { %p2130_p4 = pnand %p2129_p3, %p2123_p0 }
   0xf   :  { %2133 = shalt.err (!%p2130_p4)
}
  0x10   :  { %s2349_s24 = smov 1024   ;;  %s2350_s25 = smov 64  }
  0x11   :  { %46 = dma.hbm_to_vmem [thread:$0]  %s2986_s1, 65536, %s41_s22, [#allocation6], %s2349_s24, %s2349_s24, %s2350_s25  }
  0x12   :  { %s2351_s28 = smov [#allocation8]   ;;  %s2352_s30 = smov [#allocation11]  }
  0x13   :  { %s63_s29 = sshll.u32 %s2351_s28, 4  ;;  %s83_s13 = sshll.u32 %s2352_s30, 4  ;;  %s64_s29 = int_to_ptr.vmem [resolvable:$true] %s63_s29  ;;  %s84_s13 = int_to_ptr.vmem [resolvable:$true] %s83_s13 }
  0x14   :  { %s2142_s14 = scalar_lea.vmem %s64_s29, 64  ;;  %p2147_p6 = scmp.lt.s32.totalorder %s64_s29, %s64_s29 }
  0x15   :  { %p2143_p5 = scmp.ne.s32.totalorder %s64_s29, %s2142_s14  ;;  %p2148_p7 = scmp.lt.s32.totalorder %s2142_s14, %s2142_s14 }
  0x17   :  { %p2149_p8 = por %p2148_p7, %p2147_p6 }
  0x19   :  { %p2150_p9 = pnand %p2149_p8, %p2143_p5 }
  0x1b   :  { %2153 = shalt.err (!%p2150_p9)
}
  0x1c   :  { %66 = dma.hbm_to_vmem [thread:$0]  %s2988_s3, 64, %s64_s29, [#allocation9]  }
  0x1d   :  { %s2162_s17 = scalar_lea.vmem %s84_s13, 64  ;;  %p2167_p11 = scmp.lt.s32.totalorder %s84_s13, %s84_s13 }
  0x1e   :  { %p2163_p10 = scmp.ne.s32.totalorder %s84_s13, %s2162_s17  ;;  %p2168_p12 = scmp.lt.s32.totalorder %s2162_s17, %s2162_s17 }
  0x20   :  { %p2169_p13 = por %p2168_p12, %p2167_p11 }
  0x22   :  { %p2170_p0 = pnand %p2169_p13, %p2163_p10 }
  0x24   :  { %2173 = shalt.err (!%p2170_p0)
}
  0x25   :  { %86 = dma.hbm_to_vmem [thread:$0]  %s2990_s5, 64, %s84_s13, [#allocation12]  }
  0x26   :  { %s2353_s19 = smov [#allocation14]   ;;  %s2354_s21 = smov [#allocation2]  }
  0x27   :  { %s105_s20 = sshll.u32 %s2353_s19, 4  ;;  %s31_s22 = sshll.u32 %s2354_s21, 4  ;;  %s106_s20 = int_to_ptr.vmem [resolvable:$true] %s105_s20  ;;  %s32_s22 = int_to_ptr.vmem [resolvable:$true] %s31_s22 }
  0x28   :  { %s2182_s23 = scalar_lea.vmem %s106_s20, 16  ;;  %s2186_s3 = scalar_lea.vmem %s106_s20, 32 }
  0x29   :  { %p2183_p1 = scmp.ne.s32.totalorder %s106_s20, %s2182_s23  ;;  %p2187_p2 = scmp.lt.s32.totalorder %s106_s20, %s106_s20 }
  0x2a   :  { %p2188_p3 = scmp.lt.s32.totalorder %s2186_s3, %s2182_s23 }
  0x2c   :  { %p2189_p4 = por %p2188_p3, %p2187_p2 }
  0x2e   :  { %p2190_p5 = pnand %p2189_p4, %p2183_p1 }
  0x30   :  { %2193 = shalt.err (!%p2190_p5)
}
  0x31   :  { %108 = dma.hbm_to_vmem [thread:$0]  %s2993_s8, 16, %s106_s20, [#allocation15]  }
  0x32   :  { %s2202_s26 = scalar_lea.vmem %s32_s22, 128  ;;  %p2207_p7 = scmp.lt.s32.totalorder %s32_s22, %s32_s22 }
  0x33   :  { %p2203_p6 = scmp.ne.s32.totalorder %s32_s22, %s2202_s26  ;;  %p2208_p8 = scmp.lt.s32.totalorder %s2202_s26, %s2202_s26 }
  0x35   :  { %p2209_p9 = por %p2208_p8, %p2207_p7 }
  0x37   :  { %p2210_p10 = pnand %p2209_p9, %p2203_p6 }
  0x39   :  { %2213 = shalt.err (!%p2210_p10)
}
  0x3a   :  { %34 = dma.hbm_to_vmem [thread:$0]  %s2985_s0, 128, %s32_s22, [#allocation3]  }
  0x3b   :  { %s2355_s28 = smov [#allocation7]   ;;  %s2356_s30 = smov [#allocation10]  }
  0x3c   :  { %s53_s29 = sshll.u32 %s2355_s28, 4  ;;  %s73_s13 = sshll.u32 %s2356_s30, 4  ;;  %s54_s29 = int_to_ptr.vmem [resolvable:$true] %s53_s29  ;;  %s74_s13 = int_to_ptr.vmem [resolvable:$true] %s73_s13 }
  0x3d   :  { %s2222_s14 = scalar_lea.vmem %s54_s29, 128  ;;  %p2227_p12 = scmp.lt.s32.totalorder %s54_s29, %s54_s29 }
  0x3e   :  { %p2223_p11 = scmp.ne.s32.totalorder %s54_s29, %s2222_s14  ;;  %p2228_p13 = scmp.lt.s32.totalorder %s2222_s14, %s2222_s14 }
  0x40   :  { %p2229_p0 = por %p2228_p13, %p2227_p12 }
  0x42   :  { %p2230_p1 = pnand %p2229_p0, %p2223_p11 }
  0x44   :  { %2233 = shalt.err (!%p2230_p1)
}
  0x45   :  { %56 = dma.hbm_to_vmem [thread:$0]  %s2987_s2, 128, %s54_s29, [#allocation6]  }
  0x46   :  { %s2242_s16 = scalar_lea.vmem %s74_s13, 64  ;;  %p2247_p3 = scmp.lt.s32.totalorder %s74_s13, %s74_s13 }
  0x47   :  { %p2243_p2 = scmp.ne.s32.totalorder %s74_s13, %s2242_s16  ;;  %p2248_p4 = scmp.lt.s32.totalorder %s2242_s16, %s2242_s16 }
  0x49   :  { %p2249_p5 = por %p2248_p4, %p2247_p3 }
  0x4b   :  { %p2250_p6 = pnand %p2249_p5, %p2243_p2 }
  0x4d   :  { %2253 = shalt.err (!%p2250_p6)
}
  0x4e   :  { %76 = dma.hbm_to_vmem [thread:$0]  %s2989_s4, 64, %s74_s13, [#allocation9]  }
  0x4f   :  { %s2357_s1 = smov [#allocation13]   ;;  %s2358_s19 = smov [#allocation16]  }
  0x50   :  { %s93_s18 = sshll.u32 %s2357_s1, 4  ;;  %s117_s20 = sshll.u32 %s2358_s19, 4  ;;  %s94_s18 = int_to_ptr.vmem [resolvable:$true] %s93_s18  ;;  %s118_s20 = int_to_ptr.vmem [resolvable:$true] %s117_s20 }
  0x51   :  { %s2262_s21 = scalar_lea.vmem %s94_s18, 64  ;;  %p2267_p8 = scmp.lt.s32.totalorder %s94_s18, %s94_s18 }
  0x52   :  { %p2263_p7 = scmp.ne.s32.totalorder %s94_s18, %s2262_s21  ;;  %p2268_p9 = scmp.lt.s32.totalorder %s2262_s21, %s2262_s21 }
  0x54   :  { %p2269_p10 = por %p2268_p9, %p2267_p8 }
  0x56   :  { %p2270_p11 = pnand %p2269_p10, %p2263_p7 }
  0x58   :  { %2273 = shalt.err (!%p2270_p11)
}
  0x59   :  { %96 = dma.hbm_to_vmem [thread:$0]  %s2991_s6, 64, %s94_s18, [#allocation12]  }
  0x5a   :  { %s2282_s23 = scalar_lea.vmem %s118_s20, 16  ;;  %s2286_s4 = scalar_lea.vmem %s118_s20, 32 }
  0x5b   :  { %p2283_p12 = scmp.ne.s32.totalorder %s118_s20, %s2282_s23  ;;  %p2287_p13 = scmp.lt.s32.totalorder %s118_s20, %s118_s20 }
  0x5c   :  { %p2288_p0 = scmp.lt.s32.totalorder %s2286_s4, %s2282_s23 }
  0x5e   :  { %p2289_p1 = por %p2288_p0, %p2287_p13 }
  0x60   :  { %p2290_p2 = pnand %p2289_p1, %p2283_p12 }
  0x62   :  { %2293 = shalt.err (!%p2290_p2)
}
  0x63   :  { %120 = dma.hbm_to_vmem [thread:$0]  %s2995_s10, 16, %s118_s20, [#allocation15]  }
  0x64   :  { %2334 = dma.done.wait [#allocation3], 128  }
  0x65   :  { %2335 = vsyncadd [#allocation3], 4294967168 }
  0x66   :  { %2336 = dma.done.wait [#allocation6], 65664  }
  0x67   :  { %2337 = vsyncadd [#allocation6], 4294901632 }
  0x68   :  { %2338 = dma.done.wait [#allocation9], 128  }
  0x69   :  { %2339 = vsyncadd [#allocation9], 4294967168 }
  0x6a   :  { %2340 = dma.done.wait [#allocation12], 128  }
  0x6b   :  { %2341 = vsyncadd [#allocation12], 4294967168 }
  0x6c   :  { %2342 = dma.done.wait [#allocation15], 32  }
  0x6d   :  { %2343 = vsyncadd [#allocation15], 4294967264  ;;  %v270_v0 = vld [vmem:[#allocation5 + $0x3c8] sm:$0xff]  ;;  %v269_v2 = vld [vmem:[#allocation5 + $0x3c0] sm:$0xff]  ;;  %vm1293_vm0 = vcmask 1041408   ;;  %vm1704_vm9 = vcmask 58368  }
  0x6e   :  { %v526_v1 = vld [vmem:[#allocation5 + $0xbc8] sm:$0xff]  ;;  %725 = vmatprep.subr.mxu0 %v270_v0  ;;  %v525_v3 = vld [vmem:[#allocation5 + $0xbc0] sm:$0xff] }
  0x6f   :  { %796 = vmatprep.subr.mxu1 %v526_v1  ;;  %v262_v4 = vld [vmem:[#allocation5 + $0x388] sm:$0xff]  ;;  %726 = vmatpush1.msra.mxu0 %v269_v2  ;;  %v261_v6 = vld [vmem:[#allocation5 + $0x380] sm:$0xff] }
  0x70   :  { %v518_v5 = vld [vmem:[#allocation5 + $0xb88] sm:$0xff]  ;;  %797 = vmatpush1.msra.mxu1 %v525_v3  ;;  %v517_v7 = vld [vmem:[#allocation5 + $0xb80] sm:$0xff]  ;;  %727 = vmatprep.subr.mxu0 %v262_v4 }
  0x71   :  { %v254_v8 = vld [vmem:[#allocation5 + $0x348] sm:$0xff]  ;;  %798 = vmatprep.subr.mxu1 %v518_v5  ;;  %v253_v10 = vld [vmem:[#allocation5 + $0x340] sm:$0xff]  ;;  %728 = vmatpush1.msra.mxu0 %v261_v6 }
  0x72   :  { %v510_v9 = vld [vmem:[#allocation5 + $0xb48] sm:$0xff]  ;;  %v509_v11 = vld [vmem:[#allocation5 + $0xb40] sm:$0xff]  ;;  %799 = vmatpush1.msra.mxu1 %v517_v7  ;;  %729 = vmatprep.subr.mxu0 %v254_v8 }
  0x73   :  { %v246_v12 = vld [vmem:[#allocation5 + $0x308] sm:$0xff]  ;;  %800 = vmatprep.subr.mxu1 %v510_v9  ;;  %v245_v14 = vld [vmem:[#allocation5 + $0x300] sm:$0xff]  ;;  %730 = vmatpush1.msra.mxu0 %v253_v10 }
  0x74   :  { %v502_v13 = vld [vmem:[#allocation5 + $0xb08] sm:$0xff]  ;;  %v501_v15 = vld [vmem:[#allocation5 + $0xb00] sm:$0xff]  ;;  %801 = vmatpush1.msra.mxu1 %v509_v11  ;;  %731 = vmatprep.subr.mxu0 %v246_v12 }
  0x75   :  { %v238_v16 = vld [vmem:[#allocation5 + $0x2c8] sm:$0xff]  ;;  %802 = vmatprep.subr.mxu1 %v502_v13  ;;  %v237_v18 = vld [vmem:[#allocation5 + $0x2c0] sm:$0xff]  ;;  %732 = vmatpush1.msra.mxu0 %v245_v14 }
  0x76   :  { %v494_v17 = vld [vmem:[#allocation5 + $0xac8] sm:$0xff]  ;;  %v493_v19 = vld [vmem:[#allocation5 + $0xac0] sm:$0xff]  ;;  %803 = vmatpush1.msra.mxu1 %v501_v15  ;;  %733 = vmatprep.subr.mxu0 %v238_v16 }
  0x77   :  { %v230_v20 = vld [vmem:[#allocation5 + $0x288] sm:$0xff]  ;;  %804 = vmatprep.subr.mxu1 %v494_v17  ;;  %v229_v22 = vld [vmem:[#allocation5 + $0x280] sm:$0xff]  ;;  %734 = vmatpush1.msra.mxu0 %v237_v18 }
  0x78   :  { %v486_v21 = vld [vmem:[#allocation5 + $0xa88] sm:$0xff]  ;;  %v485_v23 = vld [vmem:[#allocation5 + $0xa80] sm:$0xff]  ;;  %805 = vmatpush1.msra.mxu1 %v493_v19  ;;  %735 = vmatprep.subr.mxu0 %v230_v20 }
  0x79   :  { %v222_v24 = vld [vmem:[#allocation5 + $0x248] sm:$0xff]  ;;  %806 = vmatprep.subr.mxu1 %v486_v21  ;;  %v221_v26 = vld [vmem:[#allocation5 + $0x240] sm:$0xff]  ;;  %736 = vmatpush1.msra.mxu0 %v229_v22 }
  0x7a   :  { %v478_v25 = vld [vmem:[#allocation5 + $0xa48] sm:$0xff]  ;;  %v477_v27 = vld [vmem:[#allocation5 + $0xa40] sm:$0xff]  ;;  %807 = vmatpush1.msra.mxu1 %v485_v23  ;;  %737 = vmatprep.subr.mxu0 %v222_v24 }
  0x7b   :  { %v214_v28 = vld [vmem:[#allocation5 + $0x208] sm:$0xff]  ;;  %808 = vmatprep.subr.mxu1 %v478_v25  ;;  %v213_v30 = vld [vmem:[#allocation5 + $0x200] sm:$0xff]  ;;  %738 = vmatpush1.msra.mxu0 %v221_v26 }
  0x7c   :  { %v470_v29 = vld [vmem:[#allocation5 + $0xa08] sm:$0xff]  ;;  %v469_v31 = vld [vmem:[#allocation5 + $0xa00] sm:$0xff]  ;;  %809 = vmatpush1.msra.mxu1 %v477_v27  ;;  %739 = vmatprep.subr.mxu0 %v214_v28 }
  0x7d   :  { %v206_v32 = vld [vmem:[#allocation5 + $0x1c8] sm:$0xff]  ;;  %810 = vmatprep.subr.mxu1 %v470_v29  ;;  %v205_v34 = vld [vmem:[#allocation5 + $0x1c0] sm:$0xff]  ;;  %740 = vmatpush1.msra.mxu0 %v213_v30  ;;  %v663_v30 = vlaneseq }
  0x7e   :  { %v462_v33 = vld [vmem:[#allocation5 + $0x9c8] sm:$0xff]  ;;  %v461_v35 = vld [vmem:[#allocation5 + $0x9c0] sm:$0xff]  ;;  %811 = vmatpush1.msra.mxu1 %v469_v31  ;;  %741 = vmatprep.subr.mxu0 %v206_v32  ;;  %v2359_v31 = vmov 1983009808  }
  0x7f   :  { %v198_v36 = vld [vmem:[#allocation5 + $0x188] sm:$0xff]  ;;  %812 = vmatprep.subr.mxu1 %v462_v33  ;;  %v197_v38 = vld [vmem:[#allocation5 + $0x180] sm:$0xff]  ;;  %742 = vmatpush1.msra.mxu0 %v205_v34  ;;  %v706_v32 = vunpack.c.l.s4 %v2359_v31  ;;  %v495_v31 = vld [vmem:[#allocation5 + $0xad0] sm:$0xff] }
  0x80   :  { %v454_v37 = vld [vmem:[#allocation5 + $0x988] sm:$0xff]  ;;  %v453_v39 = vld [vmem:[#allocation5 + $0x980] sm:$0xff]  ;;  %813 = vmatpush1.msra.mxu1 %v461_v35  ;;  %743 = vmatprep.subr.mxu0 %v198_v36 }
  0x81   :  { %v190_v40 = vld [vmem:[#allocation5 + $0x148] sm:$0xff]  ;;  %814 = vmatprep.subr.mxu1 %v454_v37  ;;  %v189_v42 = vld [vmem:[#allocation5 + $0x140] sm:$0xff]  ;;  %744 = vmatpush1.msra.mxu0 %v197_v38 }
  0x82   :  { %v446_v41 = vld [vmem:[#allocation5 + $0x948] sm:$0xff]  ;;  %v445_v43 = vld [vmem:[#allocation5 + $0x940] sm:$0xff]  ;;  %815 = vmatpush1.msra.mxu1 %v453_v39  ;;  %745 = vmatprep.subr.mxu0 %v190_v40 }
  0x83   :  { %v182_v44 = vld [vmem:[#allocation5 + $0x108] sm:$0xff]  ;;  %816 = vmatprep.subr.mxu1 %v446_v41  ;;  %v181_v46 = vld [vmem:[#allocation5 + $0x100] sm:$0xff]  ;;  %746 = vmatpush1.msra.mxu0 %v189_v42  ;;  %v2454_v41 = vshrl.u32 %v663_v30, 7  ;;  %v707_v42 = vunpack.c.0.s8 %v706_v32  ;;  %v239_v30 = vld [vmem:[#allocation5 + $0x2d0] sm:$0xff] }
  0x84   :  { %v438_v45 = vld [vmem:[#allocation5 + $0x908] sm:$0xff]  ;;  %v437_v47 = vld [vmem:[#allocation5 + $0x900] sm:$0xff]  ;;  %817 = vmatpush1.msra.mxu1 %v445_v43  ;;  %747 = vmatprep.subr.mxu0 %v182_v44  ;;  %v232_v32 = vld [vmem:[#allocation5 + $0x298] sm:$0xff] }
  0x85   :  { %v174_v48 = vld [vmem:[#allocation5 + $0xc8] sm:$0xff]  ;;  %818 = vmatprep.subr.mxu1 %v438_v45  ;;  %v173_v50 = vld [vmem:[#allocation5 + $0xc0] sm:$0xff]  ;;  %748 = vmatpush1.msra.mxu0 %v181_v46 }
  0x86   :  { %v430_v49 = vld [vmem:[#allocation5 + $0x8c8] sm:$0xff]  ;;  %v429_v51 = vld [vmem:[#allocation5 + $0x8c0] sm:$0xff]  ;;  %819 = vmatpush1.msra.mxu1 %v437_v47  ;;  %749 = vmatprep.subr.mxu0 %v174_v48 }
  0x87   :  { %v166_v52 = vld [vmem:[#allocation5 + $0x88] sm:$0xff]  ;;  %820 = vmatprep.subr.mxu1 %v430_v49  ;;  %v165_v54 = vld [vmem:[#allocation5 + $0x80] sm:$0xff]  ;;  %750 = vmatpush1.msra.mxu0 %v173_v50  ;;  %v148_v49 = vld [vmem:[#allocation2] sm:$0xff] }
  0x88   :  { %v422_v53 = vld [vmem:[#allocation5 + $0x888] sm:$0xff]  ;;  %v421_v55 = vld [vmem:[#allocation5 + $0x880] sm:$0xff]  ;;  %821 = vmatpush1.msra.mxu1 %v429_v51  ;;  %751 = vmatprep.subr.mxu0 %v166_v52  ;;  %v710_v52 = vsub.s32 %v707_v42, %v2454_v41  ;;  %v472_v42 = vld [vmem:[#allocation5 + $0xa18] sm:$0xff] }
  0x89   :  { %v158_v56 = vld [vmem:[#allocation5 + $0x48] sm:$0xff]  ;;  %822 = vmatprep.subr.mxu1 %v422_v53  ;;  %v157_v58 = vld [vmem:[#allocation5 + $0x40] sm:$0xff]  ;;  %752 = vmatpush1.msra.mxu0 %v165_v54 }
  0x8a   :  { %v414_v57 = vld [vmem:[#allocation5 + $0x848] sm:$0xff]  ;;  %v413_v59 = vld [vmem:[#allocation5 + $0x840] sm:$0xff]  ;;  %823 = vmatpush1.msra.mxu1 %v421_v55  ;;  %753 = vmatprep.subr.mxu0 %v158_v56 }
  0x8b   :  { %v150_v60 = vld [vmem:[#allocation5 + $0x8] sm:$0xff]  ;;  %824 = vmatprep.subr.mxu1 %v414_v57  ;;  %v149_v62 = vld [vmem:[#allocation5] sm:$0xff]  ;;  %754 = vmatpush1.msra.mxu0 %v157_v58  ;;  %v704_v57 = vcombine.high %v148_v49, %v148_v49 }
  0x8c   :  { %v406_v61 = vld [vmem:[#allocation5 + $0x808] sm:$0xff]  ;;  %v405_v63 = vld [vmem:[#allocation5 + $0x800] sm:$0xff]  ;;  %825 = vmatpush1.msra.mxu1 %v413_v59  ;;  %755 = vmatprep.subr.mxu0 %v150_v60 }
  0x8d   :  { %v398_v0 = vld [vmem:[#allocation5 + $0x7c8] sm:$0xff]  ;;  %826 = vmatprep.subr.mxu1 %v406_v61  ;;  %v397_v2 = vld [vmem:[#allocation5 + $0x7c0] sm:$0xff]  ;;  %756 = vmatpush1.msra.mxu0 %v149_v62  ;;  %v2457_v62 = vrot.slane %v148_v49, %v710_v52  ;;  %v200_v49 = vld [vmem:[#allocation5 + $0x198] sm:$0xff] }
  0x8e   :  { %v654_v1 = vld [vmem:[#allocation5 + $0xfc8] sm:$0xff]  ;;  %v653_v3 = vld [vmem:[#allocation5 + $0xfc0] sm:$0xff]  ;;  %827 = vmatpush1.msra.mxu1 %v405_v63  ;;  %757 = vmatprep.subr.mxu0 %v398_v0 }
  0x8f   :  { %v390_v4 = vld [vmem:[#allocation5 + $0x788] sm:$0xff]  ;;  %828 = vmatprep.subr.mxu1 %v654_v1  ;;  %v389_v6 = vld [vmem:[#allocation5 + $0x780] sm:$0xff]  ;;  %758 = vmatpush2.msra.mxu0 %v397_v2 }
  0x90   :  { %v646_v5 = vld [vmem:[#allocation5 + $0xf88] sm:$0xff]  ;;  %v645_v7 = vld [vmem:[#allocation5 + $0xf80] sm:$0xff]  ;;  %829 = vmatpush2.msra.mxu1 %v653_v3  ;;  %759 = vmatprep.subr.mxu0 %v390_v4  ;;  %v2459_v3 = vrot.slane %v704_v57, %v710_v52  ;;  %v455_v52 = vld [vmem:[#allocation5 + $0x990] sm:$0xff] }
  0x91   :  { %v382_v8 = vld [vmem:[#allocation5 + $0x748] sm:$0xff]  ;;  %830 = vmatprep.subr.mxu1 %v646_v5  ;;  %v381_v10 = vld [vmem:[#allocation5 + $0x740] sm:$0xff]  ;;  %760 = vmatpush2.msra.mxu0 %v389_v6  ;;  %v184_v57 = vld [vmem:[#allocation5 + $0x118] sm:$0xff] }
  0x92   :  { %v638_v9 = vld [vmem:[#allocation5 + $0xf48] sm:$0xff]  ;;  %v637_v11 = vld [vmem:[#allocation5 + $0xf40] sm:$0xff]  ;;  %831 = vmatpush2.msra.mxu1 %v645_v7  ;;  %761 = vmatprep.subr.mxu0 %v382_v8  ;;  %v2463_v8 = vcombine.high %v2457_v62, %v2457_v62 }
  0x93   :  { %v374_v12 = vld [vmem:[#allocation5 + $0x708] sm:$0xff]  ;;  %832 = vmatprep.subr.mxu1 %v638_v9  ;;  %v373_v14 = vld [vmem:[#allocation5 + $0x700] sm:$0xff]  ;;  %762 = vmatpush2.msra.mxu0 %v381_v10 }
  0x94   :  { %v630_v13 = vld [vmem:[#allocation5 + $0xf08] sm:$0xff]  ;;  %v629_v15 = vld [vmem:[#allocation5 + $0xf00] sm:$0xff]  ;;  %833 = vmatpush2.msra.mxu1 %v637_v11  ;;  %763 = vmatprep.subr.mxu0 %v374_v12  ;;  %v2467_v11 = vcombine.high %v2459_v3, %v2459_v3  ;;  %v272_v12 = vld [vmem:[#allocation5 + $0x3d8] sm:$0xff] }
  0x95   :  { %v366_v16 = vld [vmem:[#allocation5 + $0x6c8] sm:$0xff]  ;;  %834 = vmatprep.subr.mxu1 %v630_v13  ;;  %v365_v18 = vld [vmem:[#allocation5 + $0x6c0] sm:$0xff]  ;;  %764 = vmatpush2.msra.mxu0 %v373_v14  ;;  %v528_v13 = vld [vmem:[#allocation5 + $0xbd8] sm:$0xff] }
  0x96   :  { %v622_v17 = vld [vmem:[#allocation5 + $0xec8] sm:$0xff]  ;;  %v621_v19 = vld [vmem:[#allocation5 + $0xec0] sm:$0xff]  ;;  %835 = vmatpush2.msra.mxu1 %v629_v15  ;;  %765 = vmatprep.subr.mxu0 %v366_v16  ;;  %v271_v14 = vld [vmem:[#allocation5 + $0x3d0] sm:$0xff] }
  0x97   :  { %v358_v20 = vld [vmem:[#allocation5 + $0x688] sm:$0xff]  ;;  %836 = vmatprep.subr.mxu1 %v622_v17  ;;  %v357_v22 = vld [vmem:[#allocation5 + $0x680] sm:$0xff]  ;;  %766 = vmatpush2.msra.mxu0 %v365_v18  ;;  %v527_v15 = vld [vmem:[#allocation5 + $0xbd0] sm:$0xff] }
  0x98   :  { %v614_v21 = vld [vmem:[#allocation5 + $0xe88] sm:$0xff]  ;;  %v613_v23 = vld [vmem:[#allocation5 + $0xe80] sm:$0xff]  ;;  %837 = vmatpush2.msra.mxu1 %v621_v19  ;;  %767 = vmatprep.subr.mxu0 %v358_v20  ;;  %v264_v16 = vld [vmem:[#allocation5 + $0x398] sm:$0xff] }
  0x99   :  { %v350_v24 = vld [vmem:[#allocation5 + $0x648] sm:$0xff]  ;;  %838 = vmatprep.subr.mxu1 %v614_v21  ;;  %v349_v26 = vld [vmem:[#allocation5 + $0x640] sm:$0xff]  ;;  %768 = vmatpush2.msra.mxu0 %v357_v22  ;;  %v520_v17 = vld [vmem:[#allocation5 + $0xb98] sm:$0xff] }
  0x9a   :  { %v606_v25 = vld [vmem:[#allocation5 + $0xe48] sm:$0xff]  ;;  %v605_v27 = vld [vmem:[#allocation5 + $0xe40] sm:$0xff]  ;;  %839 = vmatpush2.msra.mxu1 %v613_v23  ;;  %769 = vmatprep.subr.mxu0 %v350_v24  ;;  %v263_v18 = vld [vmem:[#allocation5 + $0x390] sm:$0xff] }
  0x9b   :  { %v342_v28 = vld [vmem:[#allocation5 + $0x608] sm:$0xff]  ;;  %840 = vmatprep.subr.mxu1 %v606_v25  ;;  %v341_v33 = vld [vmem:[#allocation5 + $0x600] sm:$0xff]  ;;  %770 = vmatpush2.msra.mxu0 %v349_v26  ;;  %v519_v19 = vld [vmem:[#allocation5 + $0xb90] sm:$0xff] }
  0x9c   :  { %v598_v29 = vld [vmem:[#allocation5 + $0xe08] sm:$0xff]  ;;  %v597_v34 = vld [vmem:[#allocation5 + $0xe00] sm:$0xff]  ;;  %841 = vmatpush2.msra.mxu1 %v605_v27  ;;  %771 = vmatprep.subr.mxu0 %v342_v28  ;;  %v256_v20 = vld [vmem:[#allocation5 + $0x358] sm:$0xff] }
  0x9d   :  { %v334_v35 = vld [vmem:[#allocation5 + $0x5c8] sm:$0xff]  ;;  %842 = vmatprep.subr.mxu1 %v598_v29  ;;  %v333_v37 = vld [vmem:[#allocation5 + $0x5c0] sm:$0xff]  ;;  %772 = vmatpush2.msra.mxu0 %v341_v33  ;;  %v512_v21 = vld [vmem:[#allocation5 + $0xb58] sm:$0xff] }
  0x9e   :  { %v590_v36 = vld [vmem:[#allocation5 + $0xdc8] sm:$0xff]  ;;  %v589_v38 = vld [vmem:[#allocation5 + $0xdc0] sm:$0xff]  ;;  %843 = vmatpush2.msra.mxu1 %v597_v34  ;;  %773 = vmatprep.subr.mxu0 %v334_v35  ;;  %v255_v22 = vld [vmem:[#allocation5 + $0x350] sm:$0xff] }
  0x9f   :  { %v326_v39 = vld [vmem:[#allocation5 + $0x588] sm:$0xff]  ;;  %844 = vmatprep.subr.mxu1 %v590_v36  ;;  %v325_v43 = vld [vmem:[#allocation5 + $0x580] sm:$0xff]  ;;  %774 = vmatpush2.msra.mxu0 %v333_v37  ;;  %v511_v23 = vld [vmem:[#allocation5 + $0xb50] sm:$0xff] }
  0xa0   :  { %v582_v40 = vld [vmem:[#allocation5 + $0xd88] sm:$0xff]  ;;  %v581_v44 = vld [vmem:[#allocation5 + $0xd80] sm:$0xff]  ;;  %845 = vmatpush2.msra.mxu1 %v589_v38  ;;  %775 = vmatprep.subr.mxu0 %v326_v39  ;;  %v248_v24 = vld [vmem:[#allocation5 + $0x318] sm:$0xff] }
  0xa1   :  { %v318_v45 = vld [vmem:[#allocation5 + $0x548] sm:$0xff]  ;;  %846 = vmatprep.subr.mxu1 %v582_v40  ;;  %v317_v47 = vld [vmem:[#allocation5 + $0x540] sm:$0xff]  ;;  %776 = vmatpush2.msra.mxu0 %v325_v43  ;;  %v504_v25 = vld [vmem:[#allocation5 + $0xb18] sm:$0xff] }
  0xa2   :  { %v574_v46 = vld [vmem:[#allocation5 + $0xd48] sm:$0xff]  ;;  %v573_v48 = vld [vmem:[#allocation5 + $0xd40] sm:$0xff]  ;;  %847 = vmatpush2.msra.mxu1 %v581_v44  ;;  %777 = vmatprep.subr.mxu0 %v318_v45  ;;  %v247_v26 = vld [vmem:[#allocation5 + $0x310] sm:$0xff] }
  0xa3   :  { %v310_v50 = vld [vmem:[#allocation5 + $0x508] sm:$0xff]  ;;  %848 = vmatprep.subr.mxu1 %v574_v46  ;;  %v309_v53 = vld [vmem:[#allocation5 + $0x500] sm:$0xff]  ;;  %778 = vmatpush2.msra.mxu0 %v317_v47  ;;  %v503_v27 = vld [vmem:[#allocation5 + $0xb10] sm:$0xff] }
  0xa4   :  { %v566_v51 = vld [vmem:[#allocation5 + $0xd08] sm:$0xff]  ;;  %v565_v54 = vld [vmem:[#allocation5 + $0xd00] sm:$0xff]  ;;  %849 = vmatpush2.msra.mxu1 %v573_v48  ;;  %779 = vmatprep.subr.mxu0 %v310_v50  ;;  %v240_v28 = vld [vmem:[#allocation5 + $0x2d8] sm:$0xff] }
  0xa5   :  { %v302_v55 = vld [vmem:[#allocation5 + $0x4c8] sm:$0xff]  ;;  %850 = vmatprep.subr.mxu1 %v566_v51  ;;  %v301_v58 = vld [vmem:[#allocation5 + $0x4c0] sm:$0xff]  ;;  %780 = vmatpush2.msra.mxu0 %v309_v53  ;;  %v496_v29 = vld [vmem:[#allocation5 + $0xad8] sm:$0xff] }
  0xa6   :  { %v558_v56 = vld [vmem:[#allocation5 + $0xcc8] sm:$0xff]  ;;  %v557_v59 = vld [vmem:[#allocation5 + $0xcc0] sm:$0xff]  ;;  %851 = vmatpush2.msra.mxu1 %v565_v54  ;;  %781 = vmatprep.subr.mxu0 %v302_v55  ;;  %v488_v33 = vld [vmem:[#allocation5 + $0xa98] sm:$0xff] }
  0xa7   :  { %v294_v60 = vld [vmem:[#allocation5 + $0x488] sm:$0xff]  ;;  %852 = vmatprep.subr.mxu1 %v558_v56  ;;  %v293_v63 = vld [vmem:[#allocation5 + $0x480] sm:$0xff]  ;;  %782 = vmatpush2.msra.mxu0 %v301_v58  ;;  %v231_v34 = vld [vmem:[#allocation5 + $0x290] sm:$0xff] }
  0xa8   :  { %v550_v61 = vld [vmem:[#allocation5 + $0xc88] sm:$0xff]  ;;  %v549_v0 = vld [vmem:[#allocation5 + $0xc80] sm:$0xff]  ;;  %853 = vmatpush2.msra.mxu1 %v557_v59  ;;  %783 = vmatprep.subr.mxu0 %v294_v60  ;;  %v487_v35 = vld [vmem:[#allocation5 + $0xa90] sm:$0xff] }
  0xa9   :  { %v286_v1 = vld [vmem:[#allocation5 + $0x448] sm:$0xff]  ;;  %854 = vmatprep.subr.mxu1 %v550_v61  ;;  %v285_v4 = vld [vmem:[#allocation5 + $0x440] sm:$0xff]  ;;  %784 = vmatpush2.msra.mxu0 %v293_v63  ;;  %v224_v36 = vld [vmem:[#allocation5 + $0x258] sm:$0xff] }
  0xaa   :  { %v542_v2 = vld [vmem:[#allocation5 + $0xc48] sm:$0xff]  ;;  %v541_v5 = vld [vmem:[#allocation5 + $0xc40] sm:$0xff]  ;;  %855 = vmatpush2.msra.mxu1 %v549_v0  ;;  %785 = vmatprep.subr.mxu0 %v286_v1  ;;  %v480_v37 = vld [vmem:[#allocation5 + $0xa58] sm:$0xff] }
  0xab   :  { %v278_v6 = vld [vmem:[#allocation5 + $0x408] sm:$0xff]  ;;  %856 = vmatprep.subr.mxu1 %v542_v2  ;;  %v277_v9 = vld [vmem:[#allocation5 + $0x400] sm:$0xff]  ;;  %786 = vmatpush2.msra.mxu0 %v285_v4  ;;  %v223_v38 = vld [vmem:[#allocation5 + $0x250] sm:$0xff] }
  0xac   :  { %v534_v7 = vld [vmem:[#allocation5 + $0xc08] sm:$0xff]  ;;  %857 = vmatpush2.msra.mxu1 %v541_v5  ;;  %v533_v10 = vld [vmem:[#allocation5 + $0xc00] sm:$0xff]  ;;  %787 = vmatprep.subr.mxu0 %v278_v6  ;;  %v479_v39 = vld [vmem:[#allocation5 + $0xa50] sm:$0xff] }
  0xad   :  { %858 = vmatprep.subr.mxu1 %v534_v7  ;;  %788 = vmatpush2.msra.mxu0 %v277_v9  ;;  %v216_v40 = vld [vmem:[#allocation5 + $0x218] sm:$0xff]  ;;  %v215_v43 = vld [vmem:[#allocation5 + $0x210] sm:$0xff] }
  0xae   :  { %789 = vmatprep.mubr.f32.mxu0 %v2463_v8  ;;  %859 = vmatpush2.msra.mxu1 %v533_v10  ;;  %v471_v44 = vld [vmem:[#allocation5 + $0xa10] sm:$0xff]  ;;  %v208_v45 = vld [vmem:[#allocation5 + $0x1d8] sm:$0xff] }
  0xaf   :  { %790 = vmatmul.mubr.f32.vlgmr.msra.gmra.mxu0 %v2457_v62  ;;  %860 = vmatprep.mubr.f32.mxu1 %v2467_v11  ;;  %v464_v46 = vld [vmem:[#allocation5 + $0x9d8] sm:$0xff]  ;;  %v207_v47 = vld [vmem:[#allocation5 + $0x1d0] sm:$0xff] }
  0xb0   :  { %867 = vmatprep.subr.mxu0 %v272_v12  ;;  %938 = vmatprep.subr.mxu1 %v528_v13  ;;  %v463_v48 = vld [vmem:[#allocation5 + $0x9d0] sm:$0xff]  ;;  %v456_v50 = vld [vmem:[#allocation5 + $0x998] sm:$0xff] }
  0xb1   :  { %861 = vmatmul.mubr.f32.vlgmr.msra.gmra.mxu1 %v2459_v3  ;;  %868 = vmatpush1.msra.mxu0 %v271_v14  ;;  %v199_v51 = vld [vmem:[#allocation5 + $0x190] sm:$0xff]  ;;  %v192_v53 = vld [vmem:[#allocation5 + $0x158] sm:$0xff] }
  0xb2   :  { %939 = vmatpush1.msra.mxu1 %v527_v15  ;;  %869 = vmatprep.subr.mxu0 %v264_v16  ;;  %v448_v54 = vld [vmem:[#allocation5 + $0x958] sm:$0xff]  ;;  %v191_v55 = vld [vmem:[#allocation5 + $0x150] sm:$0xff] }
  0xb3   :  { %940 = vmatprep.subr.mxu1 %v520_v17  ;;  %870 = vmatpush1.msra.mxu0 %v263_v18  ;;  %v447_v56 = vld [vmem:[#allocation5 + $0x950] sm:$0xff]  ;;  %v440_v58 = vld [vmem:[#allocation5 + $0x918] sm:$0xff] }
  0xb4   :  { %941 = vmatpush1.msra.mxu1 %v519_v19  ;;  %871 = vmatprep.subr.mxu0 %v256_v20  ;;  %v183_v59 = vld [vmem:[#allocation5 + $0x110] sm:$0xff]  ;;  %v176_v61 = vld [vmem:[#allocation5 + $0xd8] sm:$0xff] }
  0xb5   :  { %942 = vmatprep.subr.mxu1 %v512_v21  ;;  %872 = vmatpush1.msra.mxu0 %v255_v22  ;;  %v439_v60 = vld [vmem:[#allocation5 + $0x910] sm:$0xff]  ;;  %v432_v63 = vld [vmem:[#allocation5 + $0x8d8] sm:$0xff] }
  0xb6   :  { %943 = vmatpush1.msra.mxu1 %v511_v23  ;;  %873 = vmatprep.subr.mxu0 %v248_v24  ;;  %v175_v0 = vld [vmem:[#allocation5 + $0xd0] sm:$0xff]  ;;  %v168_v2 = vld [vmem:[#allocation5 + $0x98] sm:$0xff] }
  0xb7   :  { %944 = vmatprep.subr.mxu1 %v504_v25  ;;  %874 = vmatpush1.msra.mxu0 %v247_v26  ;;  %v431_v1 = vld [vmem:[#allocation5 + $0x8d0] sm:$0xff]  ;;  %v424_v4 = vld [vmem:[#allocation5 + $0x898] sm:$0xff] }
  0xb8   :  { %945 = vmatpush1.msra.mxu1 %v503_v27  ;;  %875 = vmatprep.subr.mxu0 %v240_v28  ;;  %v167_v5 = vld [vmem:[#allocation5 + $0x90] sm:$0xff]  ;;  %v160_v7 = vld [vmem:[#allocation5 + $0x58] sm:$0xff] }
  0xb9   :  { %946 = vmatprep.subr.mxu1 %v496_v29  ;;  %876 = vmatpush1.msra.mxu0 %v239_v30  ;;  %v423_v6 = vld [vmem:[#allocation5 + $0x890] sm:$0xff]  ;;  %v416_v9 = vld [vmem:[#allocation5 + $0x858] sm:$0xff] }
  0xba   :  { %947 = vmatpush1.msra.mxu1 %v495_v31  ;;  %877 = vmatprep.subr.mxu0 %v232_v32  ;;  %v159_v10 = vld [vmem:[#allocation5 + $0x50] sm:$0xff]  ;;  %v152_v13 = vld [vmem:[#allocation5 + $0x18] sm:$0xff] }
  0xbb   :  { %948 = vmatprep.subr.mxu1 %v488_v33  ;;  %878 = vmatpush1.msra.mxu0 %v231_v34  ;;  %v415_v12 = vld [vmem:[#allocation5 + $0x850] sm:$0xff]  ;;  %v408_v14 = vld [vmem:[#allocation5 + $0x818] sm:$0xff] }
  0xbc   :  { %949 = vmatpush1.msra.mxu1 %v487_v35  ;;  %879 = vmatprep.subr.mxu0 %v224_v36  ;;  %v151_v15 = vld [vmem:[#allocation5 + $0x10] sm:$0xff]  ;;  %v400_v17 = vld [vmem:[#allocation5 + $0x7d8] sm:$0xff] }
  0xbd   :  { %950 = vmatprep.subr.mxu1 %v480_v37  ;;  %880 = vmatpush1.msra.mxu0 %v223_v38  ;;  %v407_v16 = vld [vmem:[#allocation5 + $0x810] sm:$0xff]  ;;  %v656_v18 = vld [vmem:[#allocation5 + $0xfd8] sm:$0xff] }
  0xbe   :  { %951 = vmatpush1.msra.mxu1 %v479_v39  ;;  %881 = vmatprep.subr.mxu0 %v216_v40  ;;  %v399_v19 = vld [vmem:[#allocation5 + $0x7d0] sm:$0xff]  ;;  %v392_v21 = vld [vmem:[#allocation5 + $0x798] sm:$0xff] }
  0xbf   :  { %952 = vmatprep.subr.mxu1 %v472_v42  ;;  %882 = vmatpush1.msra.mxu0 %v215_v43  ;;  %v655_v20 = vld [vmem:[#allocation5 + $0xfd0] sm:$0xff]  ;;  %v648_v22 = vld [vmem:[#allocation5 + $0xf98] sm:$0xff] }
  0xc0   :  { %953 = vmatpush1.msra.mxu1 %v471_v44  ;;  %883 = vmatprep.subr.mxu0 %v208_v45  ;;  %v391_v23 = vld [vmem:[#allocation5 + $0x790] sm:$0xff]  ;;  %v384_v25 = vld [vmem:[#allocation5 + $0x758] sm:$0xff] }
  0xc1   :  { %954 = vmatprep.subr.mxu1 %v464_v46  ;;  %884 = vmatpush1.msra.mxu0 %v207_v47  ;;  %v647_v24 = vld [vmem:[#allocation5 + $0xf90] sm:$0xff]  ;;  %v640_v26 = vld [vmem:[#allocation5 + $0xf58] sm:$0xff] }
  0xc2   :  { %955 = vmatpush1.msra.mxu1 %v463_v48  ;;  %885 = vmatprep.subr.mxu0 %v200_v49  ;;  %v383_v27 = vld [vmem:[#allocation5 + $0x750] sm:$0xff]  ;;  %v376_v29 = vld [vmem:[#allocation5 + $0x718] sm:$0xff] }
  0xc3   :  { %956 = vmatprep.subr.mxu1 %v456_v50  ;;  %886 = vmatpush1.msra.mxu0 %v199_v51  ;;  %v639_v28 = vld [vmem:[#allocation5 + $0xf50] sm:$0xff]  ;;  %v632_v30 = vld [vmem:[#allocation5 + $0xf18] sm:$0xff] }
  0xc4   :  { %957 = vmatpush1.msra.mxu1 %v455_v52  ;;  %887 = vmatprep.subr.mxu0 %v192_v53  ;;  %v375_v31 = vld [vmem:[#allocation5 + $0x710] sm:$0xff]  ;;  %v368_v33 = vld [vmem:[#allocation5 + $0x6d8] sm:$0xff] }
  0xc5   :  { %958 = vmatprep.subr.mxu1 %v448_v54  ;;  %888 = vmatpush1.msra.mxu0 %v191_v55  ;;  %v631_v32 = vld [vmem:[#allocation5 + $0xf10] sm:$0xff]  ;;  %v624_v34 = vld [vmem:[#allocation5 + $0xed8] sm:$0xff] }
  0xc6   :  { %959 = vmatpush1.msra.mxu1 %v447_v56  ;;  %889 = vmatprep.subr.mxu0 %v184_v57  ;;  %v367_v35 = vld [vmem:[#allocation5 + $0x6d0] sm:$0xff]  ;;  %v360_v37 = vld [vmem:[#allocation5 + $0x698] sm:$0xff] }
  0xc7   :  { %960 = vmatprep.subr.mxu1 %v440_v58  ;;  %890 = vmatpush1.msra.mxu0 %v183_v59  ;;  %v623_v36 = vld [vmem:[#allocation5 + $0xed0] sm:$0xff]  ;;  %v616_v38 = vld [vmem:[#allocation5 + $0xe98] sm:$0xff] }
  0xc8   :  { %961 = vmatpush1.msra.mxu1 %v439_v60  ;;  %891 = vmatprep.subr.mxu0 %v176_v61  ;;  %v359_v39 = vld [vmem:[#allocation5 + $0x690] sm:$0xff]  ;;  %v352_v42 = vld [vmem:[#allocation5 + $0x658] sm:$0xff] }
  0xc9   :  { %962 = vmatprep.subr.mxu1 %v432_v63  ;;  %892 = vmatpush1.msra.mxu0 %v175_v0  ;;  %v615_v40 = vld [vmem:[#allocation5 + $0xe90] sm:$0xff]  ;;  %v608_v43 = vld [vmem:[#allocation5 + $0xe58] sm:$0xff] }
  0xca   :  { %963 = vmatpush1.msra.mxu1 %v431_v1  ;;  %893 = vmatprep.subr.mxu0 %v168_v2  ;;  %v351_v44 = vld [vmem:[#allocation5 + $0x650] sm:$0xff]  ;;  %v344_v46 = vld [vmem:[#allocation5 + $0x618] sm:$0xff] }
  0xcb   :  { %964 = vmatprep.subr.mxu1 %v424_v4  ;;  %894 = vmatpush1.msra.mxu0 %v167_v5  ;;  %v607_v45 = vld [vmem:[#allocation5 + $0xe50] sm:$0xff]  ;;  %v600_v47 = vld [vmem:[#allocation5 + $0xe18] sm:$0xff] }
  0xcc   :  { %965 = vmatpush1.msra.mxu1 %v423_v6  ;;  %895 = vmatprep.subr.mxu0 %v160_v7  ;;  %v343_v48 = vld [vmem:[#allocation5 + $0x610] sm:$0xff]  ;;  %v336_v50 = vld [vmem:[#allocation5 + $0x5d8] sm:$0xff] }
  0xcd   :  { %966 = vmatprep.subr.mxu1 %v416_v9  ;;  %896 = vmatpush1.msra.mxu0 %v159_v10  ;;  %v599_v49 = vld [vmem:[#allocation5 + $0xe10] sm:$0xff]  ;;  %v592_v51 = vld [vmem:[#allocation5 + $0xdd8] sm:$0xff] }
  0xce   :  { %967 = vmatpush1.msra.mxu1 %v415_v12  ;;  %897 = vmatprep.subr.mxu0 %v152_v13  ;;  %v335_v52 = vld [vmem:[#allocation5 + $0x5d0] sm:$0xff]  ;;  %v328_v54 = vld [vmem:[#allocation5 + $0x598] sm:$0xff] }
  0xcf   :  { %968 = vmatprep.subr.mxu1 %v408_v14  ;;  %898 = vmatpush1.msra.mxu0 %v151_v15  ;;  %v591_v53 = vld [vmem:[#allocation5 + $0xdd0] sm:$0xff]  ;;  %v584_v55 = vld [vmem:[#allocation5 + $0xd98] sm:$0xff] }
  0xd0   :  { %969 = vmatpush1.msra.mxu1 %v407_v16  ;;  %899 = vmatprep.subr.mxu0 %v400_v17  ;;  %v327_v56 = vld [vmem:[#allocation5 + $0x590] sm:$0xff]  ;;  %v320_v58 = vld [vmem:[#allocation5 + $0x558] sm:$0xff] }
  0xd1   :  { %970 = vmatprep.subr.mxu1 %v656_v18  ;;  %900 = vmatpush2.msra.mxu0 %v399_v19  ;;  %v583_v57 = vld [vmem:[#allocation5 + $0xd90] sm:$0xff]  ;;  %v576_v59 = vld [vmem:[#allocation5 + $0xd58] sm:$0xff] }
  0xd2   :  { %971 = vmatpush2.msra.mxu1 %v655_v20  ;;  %901 = vmatprep.subr.mxu0 %v392_v21  ;;  %v319_v60 = vld [vmem:[#allocation5 + $0x550] sm:$0xff]  ;;  %v312_v63 = vld [vmem:[#allocation5 + $0x518] sm:$0xff] }
  0xd3   :  { %972 = vmatprep.subr.mxu1 %v648_v22  ;;  %902 = vmatpush2.msra.mxu0 %v391_v23  ;;  %v575_v61 = vld [vmem:[#allocation5 + $0xd50] sm:$0xff]  ;;  %v568_v0 = vld [vmem:[#allocation5 + $0xd18] sm:$0xff]  ;;  %v274_v22 = vld [vmem:[#allocation5 + $0x3e8] sm:$0xff] }
  0xd4   :  { %973 = vmatpush2.msra.mxu1 %v647_v24  ;;  %903 = vmatprep.subr.mxu0 %v384_v25  ;;  %v311_v1 = vld [vmem:[#allocation5 + $0x510] sm:$0xff]  ;;  %v304_v4 = vld [vmem:[#allocation5 + $0x4d8] sm:$0xff]  ;;  %v530_v23 = vld [vmem:[#allocation5 + $0xbe8] sm:$0xff] }
  0xd5   :  { %974 = vmatprep.subr.mxu1 %v640_v26  ;;  %904 = vmatpush2.msra.mxu0 %v383_v27  ;;  %v567_v2 = vld [vmem:[#allocation5 + $0xd10] sm:$0xff]  ;;  %v560_v5 = vld [vmem:[#allocation5 + $0xcd8] sm:$0xff]  ;;  %v273_v24 = vld [vmem:[#allocation5 + $0x3e0] sm:$0xff] }
  0xd6   :  { %975 = vmatpush2.msra.mxu1 %v639_v28  ;;  %905 = vmatprep.subr.mxu0 %v376_v29  ;;  %v303_v6 = vld [vmem:[#allocation5 + $0x4d0] sm:$0xff]  ;;  %v296_v9 = vld [vmem:[#allocation5 + $0x498] sm:$0xff]  ;;  %v529_v25 = vld [vmem:[#allocation5 + $0xbe0] sm:$0xff] }
  0xd7   :  { %976 = vmatprep.subr.mxu1 %v632_v30  ;;  %906 = vmatpush2.msra.mxu0 %v375_v31  ;;  %v559_v7 = vld [vmem:[#allocation5 + $0xcd0] sm:$0xff]  ;;  %v552_v10 = vld [vmem:[#allocation5 + $0xc98] sm:$0xff]  ;;  %v266_v26 = vld [vmem:[#allocation5 + $0x3a8] sm:$0xff] }
  0xd8   :  { %977 = vmatpush2.msra.mxu1 %v631_v32  ;;  %907 = vmatprep.subr.mxu0 %v368_v33  ;;  %v295_v12 = vld [vmem:[#allocation5 + $0x490] sm:$0xff]  ;;  %v288_v14 = vld [vmem:[#allocation5 + $0x458] sm:$0xff]  ;;  %v522_v27 = vld [vmem:[#allocation5 + $0xba8] sm:$0xff] }
  0xd9   :  { %978 = vmatprep.subr.mxu1 %v624_v34  ;;  %908 = vmatpush2.msra.mxu0 %v367_v35  ;;  %v551_v13 = vld [vmem:[#allocation5 + $0xc90] sm:$0xff]  ;;  %v544_v15 = vld [vmem:[#allocation5 + $0xc58] sm:$0xff]  ;;  %v265_v28 = vld [vmem:[#allocation5 + $0x3a0] sm:$0xff] }
  0xda   :  { %979 = vmatpush2.msra.mxu1 %v623_v36  ;;  %909 = vmatprep.subr.mxu0 %v360_v37  ;;  %v287_v16 = vld [vmem:[#allocation5 + $0x450] sm:$0xff]  ;;  %v280_v18 = vld [vmem:[#allocation5 + $0x418] sm:$0xff]  ;;  %v521_v29 = vld [vmem:[#allocation5 + $0xba0] sm:$0xff] }
  0xdb   :  { %980 = vmatprep.subr.mxu1 %v616_v38  ;;  %910 = vmatpush2.msra.mxu0 %v359_v39  ;;  %v543_v17 = vld [vmem:[#allocation5 + $0xc50] sm:$0xff]  ;;  %v536_v19 = vld [vmem:[#allocation5 + $0xc18] sm:$0xff]  ;;  %v258_v30 = vld [vmem:[#allocation5 + $0x368] sm:$0xff] }
  0xdc   :  { %981 = vmatpush2.msra.mxu1 %v615_v40  ;;  %911 = vmatprep.subr.mxu0 %v352_v42  ;;  %v279_v20 = vld [vmem:[#allocation5 + $0x410] sm:$0xff]  ;;  %v514_v31 = vld [vmem:[#allocation5 + $0xb68] sm:$0xff]  ;;  %v257_v32 = vld [vmem:[#allocation5 + $0x360] sm:$0xff] }
  0xdd   :  { %982 = vmatprep.subr.mxu1 %v608_v43  ;;  %912 = vmatpush2.msra.mxu0 %v351_v44  ;;  %v535_v21 = vld [vmem:[#allocation5 + $0xc10] sm:$0xff]  ;;  %v513_v33 = vld [vmem:[#allocation5 + $0xb60] sm:$0xff]  ;;  %v250_v34 = vld [vmem:[#allocation5 + $0x328] sm:$0xff] }
  0xde   :  { %983 = vmatpush2.msra.mxu1 %v607_v45  ;;  %913 = vmatprep.subr.mxu0 %v344_v46  ;;  %v506_v35 = vld [vmem:[#allocation5 + $0xb28] sm:$0xff]  ;;  %v249_v36 = vld [vmem:[#allocation5 + $0x320] sm:$0xff] }
  0xdf   :  { %984 = vmatprep.subr.mxu1 %v600_v47  ;;  %914 = vmatpush2.msra.mxu0 %v343_v48  ;;  %v505_v37 = vld [vmem:[#allocation5 + $0xb20] sm:$0xff]  ;;  %v242_v38 = vld [vmem:[#allocation5 + $0x2e8] sm:$0xff] }
  0xe0   :  { %985 = vmatpush2.msra.mxu1 %v599_v49  ;;  %915 = vmatprep.subr.mxu0 %v336_v50  ;;  %v498_v39 = vld [vmem:[#allocation5 + $0xae8] sm:$0xff]  ;;  %v241_v40 = vld [vmem:[#allocation5 + $0x2e0] sm:$0xff] }
  0xe1   :  { %986 = vmatprep.subr.mxu1 %v592_v51  ;;  %916 = vmatpush2.msra.mxu0 %v335_v52  ;;  %v497_v42 = vld [vmem:[#allocation5 + $0xae0] sm:$0xff]  ;;  %v234_v43 = vld [vmem:[#allocation5 + $0x2a8] sm:$0xff] }
  0xe2   :  { %987 = vmatpush2.msra.mxu1 %v591_v53  ;;  %917 = vmatprep.subr.mxu0 %v328_v54  ;;  %v490_v44 = vld [vmem:[#allocation5 + $0xaa8] sm:$0xff]  ;;  %v233_v45 = vld [vmem:[#allocation5 + $0x2a0] sm:$0xff] }
  0xe3   :  { %988 = vmatprep.subr.mxu1 %v584_v55  ;;  %918 = vmatpush2.msra.mxu0 %v327_v56  ;;  %v489_v46 = vld [vmem:[#allocation5 + $0xaa0] sm:$0xff]  ;;  %v226_v47 = vld [vmem:[#allocation5 + $0x268] sm:$0xff] }
  0xe4   :  { %989 = vmatpush2.msra.mxu1 %v583_v57  ;;  %919 = vmatprep.subr.mxu0 %v320_v58  ;;  %v482_v48 = vld [vmem:[#allocation5 + $0xa68] sm:$0xff]  ;;  %v225_v49 = vld [vmem:[#allocation5 + $0x260] sm:$0xff] }
  0xe5   :  { %990 = vmatprep.subr.mxu1 %v576_v59  ;;  %920 = vmatpush2.msra.mxu0 %v319_v60  ;;  %v481_v50 = vld [vmem:[#allocation5 + $0xa60] sm:$0xff]  ;;  %v218_v51 = vld [vmem:[#allocation5 + $0x228] sm:$0xff] }
  0xe6   :  { %991 = vmatpush2.msra.mxu1 %v575_v61  ;;  %921 = vmatprep.subr.mxu0 %v312_v63  ;;  %v474_v52 = vld [vmem:[#allocation5 + $0xa28] sm:$0xff]  ;;  %v217_v53 = vld [vmem:[#allocation5 + $0x220] sm:$0xff] }
  0xe7   :  { %992 = vmatprep.subr.mxu1 %v568_v0  ;;  %922 = vmatpush2.msra.mxu0 %v311_v1  ;;  %v473_v54 = vld [vmem:[#allocation5 + $0xa20] sm:$0xff]  ;;  %v210_v55 = vld [vmem:[#allocation5 + $0x1e8] sm:$0xff] }
  0xe8   :  { %993 = vmatpush2.msra.mxu1 %v567_v2  ;;  %923 = vmatprep.subr.mxu0 %v304_v4  ;;  %v466_v56 = vld [vmem:[#allocation5 + $0x9e8] sm:$0xff]  ;;  %v209_v57 = vld [vmem:[#allocation5 + $0x1e0] sm:$0xff] }
  0xe9   :  { %994 = vmatprep.subr.mxu1 %v560_v5  ;;  %924 = vmatpush2.msra.mxu0 %v303_v6  ;;  %v465_v58 = vld [vmem:[#allocation5 + $0x9e0] sm:$0xff]  ;;  %v202_v59 = vld [vmem:[#allocation5 + $0x1a8] sm:$0xff] }
  0xea   :  { %995 = vmatpush2.msra.mxu1 %v559_v7  ;;  %925 = vmatprep.subr.mxu0 %v296_v9  ;;  %v458_v60 = vld [vmem:[#allocation5 + $0x9a8] sm:$0xff]  ;;  %v201_v61 = vld [vmem:[#allocation5 + $0x1a0] sm:$0xff] }
  0xeb   :  { %996 = vmatprep.subr.mxu1 %v552_v10  ;;  %926 = vmatpush2.msra.mxu0 %v295_v12  ;;  %v457_v63 = vld [vmem:[#allocation5 + $0x9a0] sm:$0xff]  ;;  %v194_v0 = vld [vmem:[#allocation5 + $0x168] sm:$0xff] }
  0xec   :  { %997 = vmatpush2.msra.mxu1 %v551_v13  ;;  %927 = vmatprep.subr.mxu0 %v288_v14  ;;  %v450_v1 = vld [vmem:[#allocation5 + $0x968] sm:$0xff]  ;;  %v193_v2 = vld [vmem:[#allocation5 + $0x160] sm:$0xff] }
  0xed   :  { %998 = vmatprep.subr.mxu1 %v544_v15  ;;  %928 = vmatpush2.msra.mxu0 %v287_v16  ;;  %v449_v4 = vld [vmem:[#allocation5 + $0x960] sm:$0xff]  ;;  %v186_v5 = vld [vmem:[#allocation5 + $0x128] sm:$0xff] }
  0xee   :  { %999 = vmatpush2.msra.mxu1 %v543_v17  ;;  %929 = vmatprep.subr.mxu0 %v280_v18  ;;  %v442_v6 = vld [vmem:[#allocation5 + $0x928] sm:$0xff]  ;;  %v185_v7 = vld [vmem:[#allocation5 + $0x120] sm:$0xff] }
  0xef   :  { %1000 = vmatprep.subr.mxu1 %v536_v19  ;;  %930 = vmatpush2.msra.mxu0 %v279_v20  ;;  %v441_v9 = vld [vmem:[#allocation5 + $0x920] sm:$0xff]  ;;  %v178_v10 = vld [vmem:[#allocation5 + $0xe8] sm:$0xff] }
  0xf0   :  { %931 = vmatprep.mubr.f32.mxu0 %v2463_v8  ;;  %1001 = vmatpush2.msra.mxu1 %v535_v21  ;;  %v434_v12 = vld [vmem:[#allocation5 + $0x8e8] sm:$0xff]  ;;  %v177_v13 = vld [vmem:[#allocation5 + $0xe0] sm:$0xff] }
  0xf1   :  { %932 = vmatmul.mubr.f32.vlgmr.msra.gmra.mxu0 %v2457_v62  ;;  %1002 = vmatprep.mubr.f32.mxu1 %v2467_v11  ;;  %v433_v14 = vld [vmem:[#allocation5 + $0x8e0] sm:$0xff]  ;;  %v170_v15 = vld [vmem:[#allocation5 + $0xa8] sm:$0xff] }
  0xf2   :  { %1009 = vmatprep.subr.mxu0 %v274_v22  ;;  %1080 = vmatprep.subr.mxu1 %v530_v23  ;;  %v426_v16 = vld [vmem:[#allocation5 + $0x8a8] sm:$0xff]  ;;  %v169_v17 = vld [vmem:[#allocation5 + $0xa0] sm:$0xff] }
  0xf3   :  { %1003 = vmatmul.mubr.f32.vlgmr.msra.gmra.mxu1 %v2459_v3  ;;  %1010 = vmatpush1.msra.mxu0 %v273_v24  ;;  %v425_v18 = vld [vmem:[#allocation5 + $0x8a0] sm:$0xff]  ;;  %v162_v19 = vld [vmem:[#allocation5 + $0x68] sm:$0xff] }
  0xf4   :  { %1081 = vmatpush1.msra.mxu1 %v529_v25  ;;  %1011 = vmatprep.subr.mxu0 %v266_v26  ;;  %v418_v20 = vld [vmem:[#allocation5 + $0x868] sm:$0xff]  ;;  %v161_v21 = vld [vmem:[#allocation5 + $0x60] sm:$0xff] }
  0xf5   :  { %1082 = vmatprep.subr.mxu1 %v522_v27  ;;  %1012 = vmatpush1.msra.mxu0 %v265_v28  ;;  %v417_v22 = vld [vmem:[#allocation5 + $0x860] sm:$0xff]  ;;  %v154_v23 = vld [vmem:[#allocation5 + $0x28] sm:$0xff] }
  0xf6   :  { %1083 = vmatpush1.msra.mxu1 %v521_v29  ;;  %1013 = vmatprep.subr.mxu0 %v258_v30  ;;  %v410_v24 = vld [vmem:[#allocation5 + $0x828] sm:$0xff]  ;;  %v153_v25 = vld [vmem:[#allocation5 + $0x20] sm:$0xff] }
  0xf7   :  { %1084 = vmatprep.subr.mxu1 %v514_v31  ;;  %1014 = vmatpush1.msra.mxu0 %v257_v32  ;;  %v409_v26 = vld [vmem:[#allocation5 + $0x820] sm:$0xff]  ;;  %v402_v27 = vld [vmem:[#allocation5 + $0x7e8] sm:$0xff] }
  0xf8   :  { %1085 = vmatpush1.msra.mxu1 %v513_v33  ;;  %1015 = vmatprep.subr.mxu0 %v250_v34  ;;  %v658_v28 = vld [vmem:[#allocation5 + $0xfe8] sm:$0xff]  ;;  %v401_v29 = vld [vmem:[#allocation5 + $0x7e0] sm:$0xff] }
  0xf9   :  { %1086 = vmatprep.subr.mxu1 %v506_v35  ;;  %1016 = vmatpush1.msra.mxu0 %v249_v36  ;;  %v657_v30 = vld [vmem:[#allocation5 + $0xfe0] sm:$0xff]  ;;  %v394_v31 = vld [vmem:[#allocation5 + $0x7a8] sm:$0xff] }
  0xfa   :  { %1087 = vmatpush1.msra.mxu1 %v505_v37  ;;  %1017 = vmatprep.subr.mxu0 %v242_v38  ;;  %v650_v32 = vld [vmem:[#allocation5 + $0xfa8] sm:$0xff]  ;;  %v393_v33 = vld [vmem:[#allocation5 + $0x7a0] sm:$0xff] }
  0xfb   :  { %1088 = vmatprep.subr.mxu1 %v498_v39  ;;  %1018 = vmatpush1.msra.mxu0 %v241_v40  ;;  %v649_v34 = vld [vmem:[#allocation5 + $0xfa0] sm:$0xff]  ;;  %v386_v35 = vld [vmem:[#allocation5 + $0x768] sm:$0xff] }
  0xfc   :  { %1089 = vmatpush1.msra.mxu1 %v497_v42  ;;  %1019 = vmatprep.subr.mxu0 %v234_v43  ;;  %v642_v36 = vld [vmem:[#allocation5 + $0xf68] sm:$0xff]  ;;  %v385_v37 = vld [vmem:[#allocation5 + $0x760] sm:$0xff] }
  0xfd   :  { %1090 = vmatprep.subr.mxu1 %v490_v44  ;;  %1020 = vmatpush1.msra.mxu0 %v233_v45  ;;  %v641_v38 = vld [vmem:[#allocation5 + $0xf60] sm:$0xff]  ;;  %v378_v39 = vld [vmem:[#allocation5 + $0x728] sm:$0xff] }
  0xfe   :  { %1091 = vmatpush1.msra.mxu1 %v489_v46  ;;  %1021 = vmatprep.subr.mxu0 %v226_v47  ;;  %v634_v40 = vld [vmem:[#allocation5 + $0xf28] sm:$0xff]  ;;  %v377_v42 = vld [vmem:[#allocation5 + $0x720] sm:$0xff] }
  0xff   :  { %1092 = vmatprep.subr.mxu1 %v482_v48  ;;  %1022 = vmatpush1.msra.mxu0 %v225_v49  ;;  %v633_v43 = vld [vmem:[#allocation5 + $0xf20] sm:$0xff]  ;;  %v370_v44 = vld [vmem:[#allocation5 + $0x6e8] sm:$0xff] }
 0x100   :  { %1093 = vmatpush1.msra.mxu1 %v481_v50  ;;  %1023 = vmatprep.subr.mxu0 %v218_v51  ;;  %v626_v45 = vld [vmem:[#allocation5 + $0xee8] sm:$0xff]  ;;  %v369_v46 = vld [vmem:[#allocation5 + $0x6e0] sm:$0xff] }
 0x101   :  { %1094 = vmatprep.subr.mxu1 %v474_v52  ;;  %1024 = vmatpush1.msra.mxu0 %v217_v53  ;;  %v625_v47 = vld [vmem:[#allocation5 + $0xee0] sm:$0xff]  ;;  %v362_v48 = vld [vmem:[#allocation5 + $0x6a8] sm:$0xff] }
 0x102   :  { %1095 = vmatpush1.msra.mxu1 %v473_v54  ;;  %1025 = vmatprep.subr.mxu0 %v210_v55  ;;  %v618_v49 = vld [vmem:[#allocation5 + $0xea8] sm:$0xff]  ;;  %v361_v50 = vld [vmem:[#allocation5 + $0x6a0] sm:$0xff] }
 0x103   :  { %1096 = vmatprep.subr.mxu1 %v466_v56  ;;  %1026 = vmatpush1.msra.mxu0 %v209_v57  ;;  %v617_v51 = vld [vmem:[#allocation5 + $0xea0] sm:$0xff]  ;;  %v354_v52 = vld [vmem:[#allocation5 + $0x668] sm:$0xff] }
 0x104   :  { %1097 = vmatpush1.msra.mxu1 %v465_v58  ;;  %1027 = vmatprep.subr.mxu0 %v202_v59  ;;  %v610_v53 = vld [vmem:[#allocation5 + $0xe68] sm:$0xff]  ;;  %v353_v54 = vld [vmem:[#allocation5 + $0x660] sm:$0xff] }
 0x105   :  { %1098 = vmatprep.subr.mxu1 %v458_v60  ;;  %1028 = vmatpush1.msra.mxu0 %v201_v61  ;;  %v609_v55 = vld [vmem:[#allocation5 + $0xe60] sm:$0xff]  ;;  %v346_v56 = vld [vmem:[#allocation5 + $0x628] sm:$0xff] }
 0x106   :  { %1099 = vmatpush1.msra.mxu1 %v457_v63  ;;  %1029 = vmatprep.subr.mxu0 %v194_v0  ;;  %v602_v57 = vld [vmem:[#allocation5 + $0xe28] sm:$0xff]  ;;  %v345_v58 = vld [vmem:[#allocation5 + $0x620] sm:$0xff] }
 0x107   :  { %1100 = vmatprep.subr.mxu1 %v450_v1  ;;  %1030 = vmatpush1.msra.mxu0 %v193_v2  ;;  %v601_v59 = vld [vmem:[#allocation5 + $0xe20] sm:$0xff]  ;;  %v338_v60 = vld [vmem:[#allocation5 + $0x5e8] sm:$0xff] }
 0x108   :  { %1101 = vmatpush1.msra.mxu1 %v449_v4  ;;  %1031 = vmatprep.subr.mxu0 %v186_v5  ;;  %v594_v61 = vld [vmem:[#allocation5 + $0xde8] sm:$0xff]  ;;  %v337_v63 = vld [vmem:[#allocation5 + $0x5e0] sm:$0xff] }
 0x109   :  { %1102 = vmatprep.subr.mxu1 %v442_v6  ;;  %1032 = vmatpush1.msra.mxu0 %v185_v7  ;;  %v593_v0 = vld [vmem:[#allocation5 + $0xde0] sm:$0xff]  ;;  %v330_v1 = vld [vmem:[#allocation5 + $0x5a8] sm:$0xff] }
 0x10a   :  { %1103 = vmatpush1.msra.mxu1 %v441_v9  ;;  %1033 = vmatprep.subr.mxu0 %v178_v10  ;;  %v586_v2 = vld [vmem:[#allocation5 + $0xda8] sm:$0xff]  ;;  %v329_v4 = vld [vmem:[#allocation5 + $0x5a0] sm:$0xff] }
 0x10b   :  { %1104 = vmatprep.subr.mxu1 %v434_v12  ;;  %1034 = vmatpush1.msra.mxu0 %v177_v13  ;;  %v585_v5 = vld [vmem:[#allocation5 + $0xda0] sm:$0xff]  ;;  %v322_v6 = vld [vmem:[#allocation5 + $0x568] sm:$0xff] }
 0x10c   :  { %1105 = vmatpush1.msra.mxu1 %v433_v14  ;;  %1035 = vmatprep.subr.mxu0 %v170_v15  ;;  %v578_v7 = vld [vmem:[#allocation5 + $0xd68] sm:$0xff]  ;;  %v321_v9 = vld [vmem:[#allocation5 + $0x560] sm:$0xff] }
 0x10d   :  { %1106 = vmatprep.subr.mxu1 %v426_v16  ;;  %1036 = vmatpush1.msra.mxu0 %v169_v17  ;;  %v577_v10 = vld [vmem:[#allocation5 + $0xd60] sm:$0xff]  ;;  %v314_v12 = vld [vmem:[#allocation5 + $0x528] sm:$0xff] }
 0x10e   :  { %1107 = vmatpush1.msra.mxu1 %v425_v18  ;;  %1037 = vmatprep.subr.mxu0 %v162_v19  ;;  %v570_v13 = vld [vmem:[#allocation5 + $0xd28] sm:$0xff]  ;;  %v313_v14 = vld [vmem:[#allocation5 + $0x520] sm:$0xff] }
 0x10f   :  { %1108 = vmatprep.subr.mxu1 %v418_v20  ;;  %1038 = vmatpush1.msra.mxu0 %v161_v21  ;;  %v569_v15 = vld [vmem:[#allocation5 + $0xd20] sm:$0xff]  ;;  %v306_v16 = vld [vmem:[#allocation5 + $0x4e8] sm:$0xff] }
 0x110   :  { %1109 = vmatpush1.msra.mxu1 %v417_v22  ;;  %1039 = vmatprep.subr.mxu0 %v154_v23  ;;  %v562_v17 = vld [vmem:[#allocation5 + $0xce8] sm:$0xff]  ;;  %v305_v18 = vld [vmem:[#allocation5 + $0x4e0] sm:$0xff] }
 0x111   :  { %1110 = vmatprep.subr.mxu1 %v410_v24  ;;  %1040 = vmatpush1.msra.mxu0 %v153_v25  ;;  %v561_v19 = vld [vmem:[#allocation5 + $0xce0] sm:$0xff]  ;;  %v298_v20 = vld [vmem:[#allocation5 + $0x4a8] sm:$0xff] }
 0x112   :  { %1111 = vmatpush1.msra.mxu1 %v409_v26  ;;  %1041 = vmatprep.subr.mxu0 %v402_v27  ;;  %v554_v21 = vld [vmem:[#allocation5 + $0xca8] sm:$0xff]  ;;  %v297_v22 = vld [vmem:[#allocation5 + $0x4a0] sm:$0xff] }
 0x113   :  { %1112 = vmatprep.subr.mxu1 %v658_v28  ;;  %1042 = vmatpush2.msra.mxu0 %v401_v29  ;;  %v553_v23 = vld [vmem:[#allocation5 + $0xca0] sm:$0xff]  ;;  %v290_v24 = vld [vmem:[#allocation5 + $0x468] sm:$0xff] }
 0x114   :  { %1113 = vmatpush2.msra.mxu1 %v657_v30  ;;  %1043 = vmatprep.subr.mxu0 %v394_v31  ;;  %v546_v25 = vld [vmem:[#allocation5 + $0xc68] sm:$0xff]  ;;  %v289_v26 = vld [vmem:[#allocation5 + $0x460] sm:$0xff] }
 0x115   :  { %1114 = vmatprep.subr.mxu1 %v650_v32  ;;  %1044 = vmatpush2.msra.mxu0 %v393_v33  ;;  %v545_v27 = vld [vmem:[#allocation5 + $0xc60] sm:$0xff]  ;;  %v282_v28 = vld [vmem:[#allocation5 + $0x428] sm:$0xff]  ;;  %v276_v32 = vld [vmem:[#allocation5 + $0x3f8] sm:$0xff] }
 0x116   :  { %1115 = vmatpush2.msra.mxu1 %v649_v34  ;;  %1045 = vmatprep.subr.mxu0 %v386_v35  ;;  %v538_v29 = vld [vmem:[#allocation5 + $0xc28] sm:$0xff]  ;;  %v281_v30 = vld [vmem:[#allocation5 + $0x420] sm:$0xff]  ;;  %v532_v33 = vld [vmem:[#allocation5 + $0xbf8] sm:$0xff] }
 0x117   :  { %1116 = vmatprep.subr.mxu1 %v642_v36  ;;  %1046 = vmatpush2.msra.mxu0 %v385_v37  ;;  %v537_v31 = vld [vmem:[#allocation5 + $0xc20] sm:$0xff]  ;;  %v275_v34 = vld [vmem:[#allocation5 + $0x3f0] sm:$0xff]  ;;  %v268_v36 = vld [vmem:[#allocation5 + $0x3b8] sm:$0xff] }
 0x118   :  { %1117 = vmatpush2.msra.mxu1 %v641_v38  ;;  %1047 = vmatprep.subr.mxu0 %v378_v39  ;;  %v531_v35 = vld [vmem:[#allocation5 + $0xbf0] sm:$0xff]  ;;  %v524_v37 = vld [vmem:[#allocation5 + $0xbb8] sm:$0xff] }
 0x119   :  { %1118 = vmatprep.subr.mxu1 %v634_v40  ;;  %1048 = vmatpush2.msra.mxu0 %v377_v42  ;;  %v267_v38 = vld [vmem:[#allocation5 + $0x3b0] sm:$0xff]  ;;  %v260_v40 = vld [vmem:[#allocation5 + $0x378] sm:$0xff] }
 0x11a   :  { %1119 = vmatpush2.msra.mxu1 %v633_v43  ;;  %1049 = vmatprep.subr.mxu0 %v370_v44  ;;  %v523_v39 = vld [vmem:[#allocation5 + $0xbb0] sm:$0xff]  ;;  %v516_v42 = vld [vmem:[#allocation5 + $0xb78] sm:$0xff] }
 0x11b   :  { %1120 = vmatprep.subr.mxu1 %v626_v45  ;;  %1050 = vmatpush2.msra.mxu0 %v369_v46  ;;  %v259_v43 = vld [vmem:[#allocation5 + $0x370] sm:$0xff]  ;;  %v252_v45 = vld [vmem:[#allocation5 + $0x338] sm:$0xff] }
 0x11c   :  { %1121 = vmatpush2.msra.mxu1 %v625_v47  ;;  %1051 = vmatprep.subr.mxu0 %v362_v48  ;;  %v515_v44 = vld [vmem:[#allocation5 + $0xb70] sm:$0xff]  ;;  %v508_v46 = vld [vmem:[#allocation5 + $0xb38] sm:$0xff] }
 0x11d   :  { %1122 = vmatprep.subr.mxu1 %v618_v49  ;;  %1052 = vmatpush2.msra.mxu0 %v361_v50  ;;  %v251_v47 = vld [vmem:[#allocation5 + $0x330] sm:$0xff]  ;;  %v244_v49 = vld [vmem:[#allocation5 + $0x2f8] sm:$0xff] }
 0x11e   :  { %1123 = vmatpush2.msra.mxu1 %v617_v51  ;;  %1053 = vmatprep.subr.mxu0 %v354_v52  ;;  %v507_v48 = vld [vmem:[#allocation5 + $0xb30] sm:$0xff]  ;;  %v500_v50 = vld [vmem:[#allocation5 + $0xaf8] sm:$0xff] }
 0x11f   :  { %1124 = vmatprep.subr.mxu1 %v610_v53  ;;  %1054 = vmatpush2.msra.mxu0 %v353_v54  ;;  %v243_v51 = vld [vmem:[#allocation5 + $0x2f0] sm:$0xff]  ;;  %v236_v53 = vld [vmem:[#allocation5 + $0x2b8] sm:$0xff] }
 0x120   :  { %1125 = vmatpush2.msra.mxu1 %v609_v55  ;;  %1055 = vmatprep.subr.mxu0 %v346_v56  ;;  %v499_v52 = vld [vmem:[#allocation5 + $0xaf0] sm:$0xff]  ;;  %v492_v54 = vld [vmem:[#allocation5 + $0xab8] sm:$0xff] }
 0x121   :  { %1126 = vmatprep.subr.mxu1 %v602_v57  ;;  %1056 = vmatpush2.msra.mxu0 %v345_v58  ;;  %v235_v55 = vld [vmem:[#allocation5 + $0x2b0] sm:$0xff]  ;;  %v228_v57 = vld [vmem:[#allocation5 + $0x278] sm:$0xff] }
 0x122   :  { %1127 = vmatpush2.msra.mxu1 %v601_v59  ;;  %1057 = vmatprep.subr.mxu0 %v338_v60  ;;  %v491_v56 = vld [vmem:[#allocation5 + $0xab0] sm:$0xff]  ;;  %v484_v58 = vld [vmem:[#allocation5 + $0xa78] sm:$0xff] }
 0x123   :  { %1128 = vmatprep.subr.mxu1 %v594_v61  ;;  %1058 = vmatpush2.msra.mxu0 %v337_v63  ;;  %v227_v59 = vld [vmem:[#allocation5 + $0x270] sm:$0xff]  ;;  %v220_v61 = vld [vmem:[#allocation5 + $0x238] sm:$0xff] }
 0x124   :  { %1129 = vmatpush2.msra.mxu1 %v593_v0  ;;  %1059 = vmatprep.subr.mxu0 %v330_v1  ;;  %v483_v60 = vld [vmem:[#allocation5 + $0xa70] sm:$0xff]  ;;  %v476_v63 = vld [vmem:[#allocation5 + $0xa38] sm:$0xff] }
 0x125   :  { %1130 = vmatprep.subr.mxu1 %v586_v2  ;;  %1060 = vmatpush2.msra.mxu0 %v329_v4  ;;  %v219_v0 = vld [vmem:[#allocation5 + $0x230] sm:$0xff]  ;;  %v212_v2 = vld [vmem:[#allocation5 + $0x1f8] sm:$0xff] }
 0x126   :  { %1131 = vmatpush2.msra.mxu1 %v585_v5  ;;  %1061 = vmatprep.subr.mxu0 %v322_v6  ;;  %v475_v1 = vld [vmem:[#allocation5 + $0xa30] sm:$0xff]  ;;  %v468_v4 = vld [vmem:[#allocation5 + $0x9f8] sm:$0xff] }
 0x127   :  { %1132 = vmatprep.subr.mxu1 %v578_v7  ;;  %1062 = vmatpush2.msra.mxu0 %v321_v9  ;;  %v211_v5 = vld [vmem:[#allocation5 + $0x1f0] sm:$0xff]  ;;  %v204_v7 = vld [vmem:[#allocation5 + $0x1b8] sm:$0xff] }
 0x128   :  { %1133 = vmatpush2.msra.mxu1 %v577_v10  ;;  %1063 = vmatprep.subr.mxu0 %v314_v12  ;;  %v467_v6 = vld [vmem:[#allocation5 + $0x9f0] sm:$0xff]  ;;  %v460_v9 = vld [vmem:[#allocation5 + $0x9b8] sm:$0xff] }
 0x129   :  { %1134 = vmatprep.subr.mxu1 %v570_v13  ;;  %1064 = vmatpush2.msra.mxu0 %v313_v14  ;;  %v203_v10 = vld [vmem:[#allocation5 + $0x1b0] sm:$0xff]  ;;  %v196_v13 = vld [vmem:[#allocation5 + $0x178] sm:$0xff] }
 0x12a   :  { %1135 = vmatpush2.msra.mxu1 %v569_v15  ;;  %1065 = vmatprep.subr.mxu0 %v306_v16  ;;  %v459_v12 = vld [vmem:[#allocation5 + $0x9b0] sm:$0xff]  ;;  %v452_v14 = vld [vmem:[#allocation5 + $0x978] sm:$0xff] }
 0x12b   :  { %1136 = vmatprep.subr.mxu1 %v562_v17  ;;  %1066 = vmatpush2.msra.mxu0 %v305_v18  ;;  %v195_v15 = vld [vmem:[#allocation5 + $0x170] sm:$0xff]  ;;  %v188_v17 = vld [vmem:[#allocation5 + $0x138] sm:$0xff] }
 0x12c   :  { %1137 = vmatpush2.msra.mxu1 %v561_v19  ;;  %1067 = vmatprep.subr.mxu0 %v298_v20  ;;  %v451_v16 = vld [vmem:[#allocation5 + $0x970] sm:$0xff]  ;;  %v444_v18 = vld [vmem:[#allocation5 + $0x938] sm:$0xff] }
 0x12d   :  { %1138 = vmatprep.subr.mxu1 %v554_v21  ;;  %1068 = vmatpush2.msra.mxu0 %v297_v22  ;;  %v187_v19 = vld [vmem:[#allocation5 + $0x130] sm:$0xff]  ;;  %v180_v21 = vld [vmem:[#allocation5 + $0xf8] sm:$0xff] }
 0x12e   :  { %1139 = vmatpush2.msra.mxu1 %v553_v23  ;;  %1069 = vmatprep.subr.mxu0 %v290_v24  ;;  %v443_v20 = vld [vmem:[#allocation5 + $0x930] sm:$0xff]  ;;  %v436_v22 = vld [vmem:[#allocation5 + $0x8f8] sm:$0xff] }
 0x12f   :  { %1140 = vmatprep.subr.mxu1 %v546_v25  ;;  %1070 = vmatpush2.msra.mxu0 %v289_v26  ;;  %v179_v23 = vld [vmem:[#allocation5 + $0xf0] sm:$0xff]  ;;  %v172_v25 = vld [vmem:[#allocation5 + $0xb8] sm:$0xff] }
 0x130   :  { %1141 = vmatpush2.msra.mxu1 %v545_v27  ;;  %1071 = vmatprep.subr.mxu0 %v282_v28  ;;  %v435_v24 = vld [vmem:[#allocation5 + $0x8f0] sm:$0xff]  ;;  %v428_v26 = vld [vmem:[#allocation5 + $0x8b8] sm:$0xff] }
 0x131   :  { %1142 = vmatprep.subr.mxu1 %v538_v29  ;;  %1072 = vmatpush2.msra.mxu0 %v281_v30  ;;  %v171_v27 = vld [vmem:[#allocation5 + $0xb0] sm:$0xff]  ;;  %v164_v29 = vld [vmem:[#allocation5 + $0x78] sm:$0xff] }
 0x132   :  { %1073 = vmatprep.mubr.f32.mxu0 %v2463_v8  ;;  %1143 = vmatpush2.msra.mxu1 %v537_v31  ;;  %v427_v28 = vld [vmem:[#allocation5 + $0x8b0] sm:$0xff]  ;;  %v420_v30 = vld [vmem:[#allocation5 + $0x878] sm:$0xff] }
 0x133   :  { %1074 = vmatmul.mubr.f32.vlgmr.msra.gmra.mxu0 %v2457_v62  ;;  %1144 = vmatprep.mubr.f32.mxu1 %v2467_v11  ;;  %v163_v31 = vld [vmem:[#allocation5 + $0x70] sm:$0xff] }
 0x134   :  { %1151 = vmatprep.subr.mxu0 %v276_v32  ;;  %1222 = vmatprep.subr.mxu1 %v532_v33  ;;  %v419_v32 = vld [vmem:[#allocation5 + $0x870] sm:$0xff]  ;;  %v156_v33 = vld [vmem:[#allocation5 + $0x38] sm:$0xff] }
 0x135   :  { %1145 = vmatmul.mubr.f32.vlgmr.msra.gmra.mxu1 %v2459_v3  ;;  %1152 = vmatpush1.msra.mxu0 %v275_v34  ;;  %v412_v34 = vld [vmem:[#allocation5 + $0x838] sm:$0xff] }
 0x136   :  { %1223 = vmatpush1.msra.mxu1 %v531_v35  ;;  %1153 = vmatprep.subr.mxu0 %v268_v36  ;;  %v155_v35 = vld [vmem:[#allocation5 + $0x30] sm:$0xff] }
 0x137   :  { %1224 = vmatprep.subr.mxu1 %v524_v37  ;;  %1154 = vmatpush1.msra.mxu0 %v267_v38  ;;  %v411_v36 = vld [vmem:[#allocation5 + $0x830] sm:$0xff]  ;;  %v404_v37 = vld [vmem:[#allocation5 + $0x7f8] sm:$0xff] }
 0x138   :  { %1225 = vmatpush1.msra.mxu1 %v523_v39  ;;  %1155 = vmatprep.subr.mxu0 %v260_v40  ;;  %v660_v38 = vld [vmem:[#allocation5 + $0xff8] sm:$0xff]  ;;  %v403_v39 = vld [vmem:[#allocation5 + $0x7f0] sm:$0xff] }
 0x139   :  { %1226 = vmatprep.subr.mxu1 %v516_v42  ;;  %1156 = vmatpush1.msra.mxu0 %v259_v43  ;;  %v659_v40 = vld [vmem:[#allocation5 + $0xff0] sm:$0xff]  ;;  %v396_v42 = vld [vmem:[#allocation5 + $0x7b8] sm:$0xff] }
 0x13a   :  { %1227 = vmatpush1.msra.mxu1 %v515_v44  ;;  %1157 = vmatprep.subr.mxu0 %v252_v45  ;;  %v652_v43 = vld [vmem:[#allocation5 + $0xfb8] sm:$0xff]  ;;  %v395_v44 = vld [vmem:[#allocation5 + $0x7b0] sm:$0xff] }
 0x13b   :  { %1228 = vmatprep.subr.mxu1 %v508_v46  ;;  %1158 = vmatpush1.msra.mxu0 %v251_v47  ;;  %v651_v45 = vld [vmem:[#allocation5 + $0xfb0] sm:$0xff]  ;;  %v388_v46 = vld [vmem:[#allocation5 + $0x778] sm:$0xff] }
 0x13c   :  { %1229 = vmatpush1.msra.mxu1 %v507_v48  ;;  %1159 = vmatprep.subr.mxu0 %v244_v49  ;;  %v644_v47 = vld [vmem:[#allocation5 + $0xf78] sm:$0xff]  ;;  %v387_v48 = vld [vmem:[#allocation5 + $0x770] sm:$0xff] }
 0x13d   :  { %1230 = vmatprep.subr.mxu1 %v500_v50  ;;  %1160 = vmatpush1.msra.mxu0 %v243_v51  ;;  %v643_v49 = vld [vmem:[#allocation5 + $0xf70] sm:$0xff]  ;;  %v380_v50 = vld [vmem:[#allocation5 + $0x738] sm:$0xff] }
 0x13e   :  { %1231 = vmatpush1.msra.mxu1 %v499_v52  ;;  %1161 = vmatprep.subr.mxu0 %v236_v53  ;;  %v636_v51 = vld [vmem:[#allocation5 + $0xf38] sm:$0xff]  ;;  %v379_v52 = vld [vmem:[#allocation5 + $0x730] sm:$0xff] }
 0x13f   :  { %1232 = vmatprep.subr.mxu1 %v492_v54  ;;  %1162 = vmatpush1.msra.mxu0 %v235_v55  ;;  %v635_v53 = vld [vmem:[#allocation5 + $0xf30] sm:$0xff]  ;;  %v372_v54 = vld [vmem:[#allocation5 + $0x6f8] sm:$0xff] }
 0x140   :  { %1233 = vmatpush1.msra.mxu1 %v491_v56  ;;  %1163 = vmatprep.subr.mxu0 %v228_v57  ;;  %v628_v55 = vld [vmem:[#allocation5 + $0xef8] sm:$0xff]  ;;  %v371_v56 = vld [vmem:[#allocation5 + $0x6f0] sm:$0xff] }
 0x141   :  { %1234 = vmatprep.subr.mxu1 %v484_v58  ;;  %1164 = vmatpush1.msra.mxu0 %v227_v59  ;;  %v627_v57 = vld [vmem:[#allocation5 + $0xef0] sm:$0xff]  ;;  %v364_v58 = vld [vmem:[#allocation5 + $0x6b8] sm:$0xff] }
 0x142   :  { %1235 = vmatpush1.msra.mxu1 %v483_v60  ;;  %1165 = vmatprep.subr.mxu0 %v220_v61  ;;  %v620_v59 = vld [vmem:[#allocation5 + $0xeb8] sm:$0xff]  ;;  %v363_v60 = vld [vmem:[#allocation5 + $0x6b0] sm:$0xff] }
 0x143   :  { %1236 = vmatprep.subr.mxu1 %v476_v63  ;;  %1166 = vmatpush1.msra.mxu0 %v219_v0  ;;  %v619_v61 = vld [vmem:[#allocation5 + $0xeb0] sm:$0xff]  ;;  %v356_v63 = vld [vmem:[#allocation5 + $0x678] sm:$0xff] }
 0x144   :  { %1237 = vmatpush1.msra.mxu1 %v475_v1  ;;  %1167 = vmatprep.subr.mxu0 %v212_v2  ;;  %v612_v0 = vld [vmem:[#allocation5 + $0xe78] sm:$0xff]  ;;  %v355_v1 = vld [vmem:[#allocation5 + $0x670] sm:$0xff] }
 0x145   :  { %1238 = vmatprep.subr.mxu1 %v468_v4  ;;  %1168 = vmatpush1.msra.mxu0 %v211_v5  ;;  %v611_v2 = vld [vmem:[#allocation5 + $0xe70] sm:$0xff]  ;;  %v348_v4 = vld [vmem:[#allocation5 + $0x638] sm:$0xff] }
 0x146   :  { %1239 = vmatpush1.msra.mxu1 %v467_v6  ;;  %1169 = vmatprep.subr.mxu0 %v204_v7  ;;  %v604_v5 = vld [vmem:[#allocation5 + $0xe38] sm:$0xff]  ;;  %v347_v6 = vld [vmem:[#allocation5 + $0x630] sm:$0xff] }
 0x147   :  { %1240 = vmatprep.subr.mxu1 %v460_v9  ;;  %1170 = vmatpush1.msra.mxu0 %v203_v10  ;;  %v603_v7 = vld [vmem:[#allocation5 + $0xe30] sm:$0xff]  ;;  %v340_v9 = vld [vmem:[#allocation5 + $0x5f8] sm:$0xff] }
 0x148   :  { %1241 = vmatpush1.msra.mxu1 %v459_v12  ;;  %1171 = vmatprep.subr.mxu0 %v196_v13  ;;  %v596_v10 = vld [vmem:[#allocation5 + $0xdf8] sm:$0xff]  ;;  %v339_v12 = vld [vmem:[#allocation5 + $0x5f0] sm:$0xff] }
 0x149   :  { %1242 = vmatprep.subr.mxu1 %v452_v14  ;;  %1172 = vmatpush1.msra.mxu0 %v195_v15  ;;  %v595_v13 = vld [vmem:[#allocation5 + $0xdf0] sm:$0xff]  ;;  %v332_v14 = vld [vmem:[#allocation5 + $0x5b8] sm:$0xff] }
 0x14a   :  { %1243 = vmatpush1.msra.mxu1 %v451_v16  ;;  %1173 = vmatprep.subr.mxu0 %v188_v17  ;;  %v588_v15 = vld [vmem:[#allocation5 + $0xdb8] sm:$0xff]  ;;  %v331_v16 = vld [vmem:[#allocation5 + $0x5b0] sm:$0xff] }
 0x14b   :  { %1244 = vmatprep.subr.mxu1 %v444_v18  ;;  %1174 = vmatpush1.msra.mxu0 %v187_v19  ;;  %v587_v17 = vld [vmem:[#allocation5 + $0xdb0] sm:$0xff]  ;;  %v324_v18 = vld [vmem:[#allocation5 + $0x578] sm:$0xff] }
 0x14c   :  { %1245 = vmatpush1.msra.mxu1 %v443_v20  ;;  %1175 = vmatprep.subr.mxu0 %v180_v21  ;;  %v580_v19 = vld [vmem:[#allocation5 + $0xd78] sm:$0xff]  ;;  %v323_v20 = vld [vmem:[#allocation5 + $0x570] sm:$0xff] }
 0x14d   :  { %1246 = vmatprep.subr.mxu1 %v436_v22  ;;  %1176 = vmatpush1.msra.mxu0 %v179_v23  ;;  %v579_v21 = vld [vmem:[#allocation5 + $0xd70] sm:$0xff]  ;;  %v316_v22 = vld [vmem:[#allocation5 + $0x538] sm:$0xff] }
 0x14e   :  { %1247 = vmatpush1.msra.mxu1 %v435_v24  ;;  %1177 = vmatprep.subr.mxu0 %v172_v25  ;;  %v572_v23 = vld [vmem:[#allocation5 + $0xd38] sm:$0xff]  ;;  %v315_v24 = vld [vmem:[#allocation5 + $0x530] sm:$0xff] }
 0x14f   :  { %1248 = vmatprep.subr.mxu1 %v428_v26  ;;  %1178 = vmatpush1.msra.mxu0 %v171_v27  ;;  %v571_v25 = vld [vmem:[#allocation5 + $0xd30] sm:$0xff]  ;;  %v308_v26 = vld [vmem:[#allocation5 + $0x4f8] sm:$0xff] }
 0x150   :  { %1249 = vmatpush1.msra.mxu1 %v427_v28  ;;  %1179 = vmatprep.subr.mxu0 %v164_v29  ;;  %v564_v27 = vld [vmem:[#allocation5 + $0xcf8] sm:$0xff]  ;;  %v307_v28 = vld [vmem:[#allocation5 + $0x4f0] sm:$0xff] }
 0x151   :  { %1250 = vmatprep.subr.mxu1 %v420_v30  ;;  %1180 = vmatpush1.msra.mxu0 %v163_v31  ;;  %v563_v29 = vld [vmem:[#allocation5 + $0xcf0] sm:$0xff]  ;;  %v300_v30 = vld [vmem:[#allocation5 + $0x4b8] sm:$0xff] }
 0x152   :  { %1251 = vmatpush1.msra.mxu1 %v419_v32  ;;  %1181 = vmatprep.subr.mxu0 %v156_v33  ;;  %v556_v31 = vld [vmem:[#allocation5 + $0xcb8] sm:$0xff]  ;;  %v299_v32 = vld [vmem:[#allocation5 + $0x4b0] sm:$0xff] }
 0x153   :  { %1252 = vmatprep.subr.mxu1 %v412_v34  ;;  %1182 = vmatpush1.msra.mxu0 %v155_v35  ;;  %v555_v33 = vld [vmem:[#allocation5 + $0xcb0] sm:$0xff]  ;;  %v292_v34 = vld [vmem:[#allocation5 + $0x478] sm:$0xff] }
 0x154   :  { %1253 = vmatpush1.msra.mxu1 %v411_v36  ;;  %1183 = vmatprep.subr.mxu0 %v404_v37  ;;  %v548_v35 = vld [vmem:[#allocation5 + $0xc78] sm:$0xff]  ;;  %v291_v36 = vld [vmem:[#allocation5 + $0x470] sm:$0xff] }
 0x155   :  { %1254 = vmatprep.subr.mxu1 %v660_v38  ;;  %1184 = vmatpush2.msra.mxu0 %v403_v39  ;;  %v547_v37 = vld [vmem:[#allocation5 + $0xc70] sm:$0xff]  ;;  %v284_v38 = vld [vmem:[#allocation5 + $0x438] sm:$0xff] }
 0x156   :  { %1255 = vmatpush2.msra.mxu1 %v659_v40  ;;  %1185 = vmatprep.subr.mxu0 %v396_v42  ;;  %v540_v39 = vld [vmem:[#allocation5 + $0xc38] sm:$0xff]  ;;  %v283_v40 = vld [vmem:[#allocation5 + $0x430] sm:$0xff] }
 0x157   :  { %1256 = vmatprep.subr.mxu1 %v652_v43  ;;  %1186 = vmatpush2.msra.mxu0 %v395_v44  ;;  %v539_v42 = vld [vmem:[#allocation5 + $0xc30] sm:$0xff]  ;;  %v2486_v43 = vsub.s32 0, %v2454_v41  ;;  %v2489_v44 = vsub.s32 1, %v2454_v41 }
 0x158   :  { %1257 = vmatpush2.msra.mxu1 %v651_v45  ;;  %1187 = vmatprep.subr.mxu0 %v388_v46  ;;  %v661_v45 = vld [vmem:[#allocation7] sm:$0xff] }
 0x159   :  { %1258 = vmatprep.subr.mxu1 %v644_v47  ;;  %1188 = vmatpush2.msra.mxu0 %v387_v48  ;;  %v666_v47 = vrot.slane %v661_v45, %v2486_v43  ;;  %v670_v48 = vrot.slane %v661_v45, %v2489_v44 }
 0x15a   :  { %1259 = vmatpush2.msra.mxu1 %v643_v49  ;;  %1189 = vmatprep.subr.mxu0 %v380_v50 }
 0x15b   :  { %1260 = vmatprep.subr.mxu1 %v636_v51  ;;  %1190 = vmatpush2.msra.mxu0 %v379_v52  ;;  %v2497_v51 = vsub.s32 3, %v2454_v41 }
 0x15c   :  { %1261 = vmatpush2.msra.mxu1 %v635_v53  ;;  %1191 = vmatprep.subr.mxu0 %v372_v54 }
 0x15d   :  { %1262 = vmatprep.subr.mxu1 %v628_v55  ;;  %1192 = vmatpush2.msra.mxu0 %v371_v56  ;;  %v678_v55 = vrot.slane %v661_v45, %v2497_v51 }
 0x15e   :  { %1263 = vmatpush2.msra.mxu1 %v627_v57  ;;  %1193 = vmatprep.subr.mxu0 %v364_v58 }
 0x15f   :  { %1264 = vmatprep.subr.mxu1 %v620_v59  ;;  %1194 = vmatpush2.msra.mxu0 %v363_v60 }
 0x160   :  { %1265 = vmatpush2.msra.mxu1 %v619_v61  ;;  %1195 = vmatprep.subr.mxu0 %v356_v63 }
 0x161   :  { %1266 = vmatprep.subr.mxu1 %v612_v0  ;;  %1196 = vmatpush2.msra.mxu0 %v355_v1 }
 0x162   :  { %1267 = vmatpush2.msra.mxu1 %v611_v2  ;;  %1197 = vmatprep.subr.mxu0 %v348_v4 }
 0x163   :  { %1268 = vmatprep.subr.mxu1 %v604_v5  ;;  %1198 = vmatpush2.msra.mxu0 %v347_v6 }
 0x164   :  { %1269 = vmatpush2.msra.mxu1 %v603_v7  ;;  %1199 = vmatprep.subr.mxu0 %v340_v9 }
 0x165   :  { %1270 = vmatprep.subr.mxu1 %v596_v10  ;;  %1200 = vmatpush2.msra.mxu0 %v339_v12  ;;  %v681_v10 = vsub.s32 4, %v2454_v41  ;;  %v685_v12 = vsub.s32 5, %v2454_v41 }
 0x166   :  { %1271 = vmatpush2.msra.mxu1 %v595_v13  ;;  %1201 = vmatprep.subr.mxu0 %v332_v14 }
 0x167   :  { %1272 = vmatprep.subr.mxu1 %v588_v15  ;;  %1202 = vmatpush2.msra.mxu0 %v331_v16  ;;  %v682_v14 = vrot.slane %v661_v45, %v681_v10  ;;  %v686_v15 = vrot.slane %v661_v45, %v685_v12  ;;  %v1519_v10 = vld [vmem:[%s2992_s7 + $0xe0] sm:$0xff] }
 0x168   :  { %1273 = vmatpush2.msra.mxu1 %v587_v17  ;;  %1203 = vmatprep.subr.mxu0 %v324_v18  ;;  %v1551_v12 = vld [vmem:[%s2992_s7 + $0x1e0] sm:$0xff] }
 0x169   :  { %1274 = vmatprep.subr.mxu1 %v580_v19  ;;  %1204 = vmatpush2.msra.mxu0 %v323_v20  ;;  %v689_v20 = vsub.s32 6, %v2454_v41 }
 0x16a   :  { %1275 = vmatpush2.msra.mxu1 %v579_v21  ;;  %1205 = vmatprep.subr.mxu0 %v316_v22  ;;  %v693_v22 = vsub.s32 7, %v2454_v41 }
 0x16b   :  { %1276 = vmatprep.subr.mxu1 %v572_v23  ;;  %1206 = vmatpush2.msra.mxu0 %v315_v24 }
 0x16c   :  { %1277 = vmatpush2.msra.mxu1 %v571_v25  ;;  %1207 = vmatprep.subr.mxu0 %v308_v26  ;;  %v690_v25 = vrot.slane %v661_v45, %v689_v20  ;;  %v694_v26 = vrot.slane %v661_v45, %v693_v22  ;;  %v1549_v20 = vld [vmem:[%s2992_s7 + $0x1d0] sm:$0xff] }
 0x16d   :  { %1278 = vmatprep.subr.mxu1 %v564_v27  ;;  %1208 = vmatpush2.msra.mxu0 %v307_v28  ;;  %v1533_v22 = vld [vmem:[%s2992_s7 + $0x150] sm:$0xff] }
 0x16e   :  { %1279 = vmatpush2.msra.mxu1 %v563_v29  ;;  %1209 = vmatprep.subr.mxu0 %v300_v30 }
 0x16f   :  { %1280 = vmatprep.subr.mxu1 %v556_v31  ;;  %1210 = vmatpush2.msra.mxu0 %v299_v32  ;;  %v791_v46 = vpop.f32.mrf.mxu0 }
 0x170   :  { %1281 = vmatpush2.msra.mxu1 %v555_v33  ;;  %1211 = vmatprep.subr.mxu0 %v292_v34  ;;  %v792_v50 = vadd.f32 %v791_v46, %v666_v47 }
 0x171   :  { %1282 = vmatprep.subr.mxu1 %v548_v35  ;;  %1212 = vmatpush2.msra.mxu0 %v291_v36  ;;  %v793_v49 = vpop.f32.mrf.mxu0 }
 0x172   :  { %1283 = vmatpush2.msra.mxu1 %v547_v37  ;;  %1213 = vmatprep.subr.mxu0 %v284_v38 }
 0x173   :  { %1284 = vmatprep.subr.mxu1 %v540_v39  ;;  %1214 = vmatpush2.msra.mxu0 %v283_v40 }
 0x174   :  { %1215 = vmatprep.mubr.f32.mxu0 %v2463_v8  ;;  %1285 = vmatpush2.msra.mxu1 %v539_v42  ;;  %v862_v8 = vpop.f32.mrf.mxu1 }
 0x175   :  { %1286 = vmatprep.mubr.f32.mxu1 %v2467_v11  ;;  %1216 = vmatmul.mubr.f32.vlgmr.msra.gmra.mxu0 %v2457_v62  ;;  %v794_v11 = vadd.f32 %v793_v49, %v670_v48  ;;  %v2494_v62 = vsub.s32 2, %v2454_v41  ;;  %v863_v52 = vadd.f32 %v862_v8, %v792_v50 }
 0x176   :  { %1287 = vmatmul.mubr.f32.vlgmr.msra.gmra.mxu1 %v2459_v3  ;;  %v864_v3 = vpop.f32.mrf.mxu1 }
 0x177   :  { %v865_v53 = vadd.f32 %v864_v3, %v794_v11  ;;  %v674_v54 = vrot.slane %v661_v45, %v2494_v62  ;;  %v1294_v57 = vsel %vm1293_vm0, %v863_v52, 0.0 }
 0x179   :  { %v1295_v58 = vsel %vm1293_vm0, %v865_v53, 0.0 }
 0x17a   :  { %v1296_v1 = vadd.f32 %v1295_v58, %v1294_v57 }
 0x1b1   :  { %v933_v56 = vpop.f32.mrf.mxu0 }
 0x1b2   :  { %v934_v59 = vadd.f32 %v933_v56, %v674_v54 }
 0x1b3   :  { %v1004_v60 = vpop.f32.mrf.mxu1  ;;  %v935_v61 = vpop.f32.mrf.mxu0 }
 0x1b4   :  { %v1005_v63 = vadd.f32 %v1004_v60, %v934_v59  ;;  %v936_v0 = vadd.f32 %v935_v61, %v678_v55  ;;  %v1522_v59 = vld [vmem:[%s2992_s7 + $0xf8] sm:$0xff] }
 0x1b5   :  { %v1006_v2 = vpop.f32.mrf.mxu1  ;;  %v1554_v60 = vld [vmem:[%s2992_s7 + $0x1f8] sm:$0xff]  ;;  %1953 = vmatprep.subr.mxu0 %v1522_v59  ;;  %v1509_v59 = vld [vmem:[%s2992_s7 + $0x90] sm:$0xff] }
 0x1b6   :  { %v1297_v4 = vsel %vm1293_vm0, %v1005_v63, 0.0  ;;  %v1007_v5 = vadd.f32 %v1006_v2, %v936_v0  ;;  %v1506_v61 = vld [vmem:[%s2992_s7 + $0x78] sm:$0xff]  ;;  %1988 = vmatprep.subr.mxu1 %v1554_v60  ;;  %v1521_v0 = vld [vmem:[%s2992_s7 + $0xf0] sm:$0xff] }
 0x1b7   :  { %v1298_v6 = vadd.f32 %v1297_v4, %v1296_v1  ;;  %v1553_v1 = vld [vmem:[%s2992_s7 + $0x1f0] sm:$0xff]  ;;  %1954 = vmatpush3.msra.mxu0 %v1506_v61 }
 0x1b8   :  { %v1299_v7 = vsel %vm1293_vm0, %v1007_v5, 0.0  ;;  %v1505_v2 = vld [vmem:[%s2992_s7 + $0x70] sm:$0xff]  ;;  %1955 = vmatprep.subr.mxu0 %v1521_v0  ;;  %v1508_v0 = vld [vmem:[%s2992_s7 + $0x88] sm:$0xff] }
 0x1b9   :  { %v1300_v9 = vadd.f32 %v1299_v7, %v1298_v6  ;;  %v1537_v4 = vld [vmem:[%s2992_s7 + $0x170] sm:$0xff]  ;;  %1956 = vmatpush3.msra.mxu0 %v1505_v2  ;;  %v1552_v6 = vld [vmem:[%s2992_s7 + $0x1e8] sm:$0xff] }
 0x1ba   :  { %v1504_v7 = vld [vmem:[%s2992_s7 + $0x68] sm:$0xff]  ;;  %v1541_v60 = vld [vmem:[%s2992_s7 + $0x190] sm:$0xff] }
 0x1bb   :  { %1301 = vadd.xlane.f32.xlu0 %v1300_v9  ;;  %v1536_v9 = vld [vmem:[%s2992_s7 + $0x168] sm:$0xff]  ;;  %v1493_v61 = vld [vmem:[%s2992_s7 + $0x10] sm:$0xff] }
 0x1bc   :  { %v1492_v2 = vld [vmem:[%s2992_s7 + $0x8] sm:$0xff] }
 0x1f3   :  { %v1075_v13 = vpop.f32.mrf.mxu0 }
 0x1f4   :  { %v1076_v18 = vadd.f32 %v1075_v13, %v682_v14  ;;  %v1503_v13 = vld [vmem:[%s2992_s7 + $0x60] sm:$0xff] }
 0x1f5   :  { %v1146_v16 = vpop.f32.mrf.mxu1  ;;  %v1077_v17 = vpop.f32.mrf.mxu0  ;;  %v1535_v14 = vld [vmem:[%s2992_s7 + $0x160] sm:$0xff] }
 0x1f6   :  { %v1078_v19 = vadd.f32 %v1077_v17, %v686_v15  ;;  %v2509_v23 = vadd.f32 %v1146_v16, %v1076_v18  ;;  %v1518_v15 = vld [vmem:[%s2992_s7 + $0xd8] sm:$0xff] }
 0x1f7   :  { %v1148_v21 = vpop.f32.mrf.mxu1  ;;  %v1550_v16 = vld [vmem:[%s2992_s7 + $0x1d8] sm:$0xff] }
 0x1f8   :  { %v2511_v24 = vadd.f32 %v1148_v21, %v1078_v19  ;;  %v1393_v29 = vsel %vm1293_vm0, %v2509_v23, 0.0  ;;  %v1502_v17 = vld [vmem:[%s2992_s7 + $0x58] sm:$0xff]  ;;  %v1517_v19 = vld [vmem:[%s2992_s7 + $0xd0] sm:$0xff] }
 0x1f9   :  { %v1534_v18 = vld [vmem:[%s2992_s7 + $0x158] sm:$0xff]  ;;  %v1501_v21 = vld [vmem:[%s2992_s7 + $0x50] sm:$0xff] }
 0x1fa   :  { %v1394_v30 = vsel %vm1293_vm0, %v2511_v24, 0.0 }
 0x1fb   :  { %v1395_v41 = vadd.f32 %v1394_v30, %v1393_v29  ;;  %v1515_v29 = vld [vmem:[%s2992_s7 + $0xc0] sm:$0xff] }
 0x1fc   :  { %v1547_v30 = vld [vmem:[%s2992_s7 + $0x1c0] sm:$0xff] }
 0x235   :  { %v1217_v27 = vpop.f32.mrf.mxu0 }
 0x236   :  { %v1288_v28 = vpop.f32.mrf.mxu1  ;;  %v1218_v31 = vadd.f32 %v1217_v27, %v690_v25  ;;  %v1516_v25 = vld [vmem:[%s2992_s7 + $0xc8] sm:$0xff] }
 0x237   :  { %v1219_v32 = vpop.f32.mrf.mxu0  ;;  %v1500_v27 = vld [vmem:[%s2992_s7 + $0x48] sm:$0xff] }
 0x238   :  { %v2517_v33 = vadd.f32 %v1288_v28, %v1218_v31  ;;  %v1220_v34 = vadd.f32 %v1219_v32, %v694_v26  ;;  %v1290_v35 = vpop.f32.mrf.mxu1  ;;  %v1548_v26 = vld [vmem:[%s2992_s7 + $0x1c8] sm:$0xff]  ;;  %v1499_v31 = vld [vmem:[%s2992_s7 + $0x40] sm:$0xff] }
 0x239   :  { %v1532_v28 = vld [vmem:[%s2992_s7 + $0x148] sm:$0xff]  ;;  %v1531_v32 = vld [vmem:[%s2992_s7 + $0x140] sm:$0xff] }
 0x23a   :  { %v1396_v36 = vsel %vm1293_vm0, %v2517_v33, 0.0  ;;  %v2521_v37 = vadd.f32 %v1290_v35, %v1220_v34  ;;  %v1514_v34 = vld [vmem:[%s2992_s7 + $0xb8] sm:$0xff] }
 0x23b   :  { %v1397_v38 = vadd.f32 %v1396_v36, %v1395_v41  ;;  %v1546_v41 = vld [vmem:[%s2992_s7 + $0x1b8] sm:$0xff] }
 0x23c   :  { %v1398_v39 = vsel %vm1293_vm0, %v2521_v37, 0.0  ;;  %v1498_v35 = vld [vmem:[%s2992_s7 + $0x38] sm:$0xff] }
 0x23d   :  { %v1399_v40 = vadd.f32 %v1398_v39, %v1397_v38  ;;  %v1530_v36 = vld [vmem:[%s2992_s7 + $0x138] sm:$0xff]  ;;  %v1513_v38 = vld [vmem:[%s2992_s7 + $0xb0] sm:$0xff] }
 0x23e   :  { %v1545_v39 = vld [vmem:[%s2992_s7 + $0x1b0] sm:$0xff] }
 0x23f   :  { %1400 = vadd.xlane.f32.xlu0 %v1399_v40  ;;  %v1497_v40 = vld [vmem:[%s2992_s7 + $0x30] sm:$0xff] }
 0x244   :  { %v1302_v42 = vpop.xlane.xlu0 %1301 }
 0x245   :  { %v1304_v45 = vmul.f32 0.001953125, %v1302_v42  ;;  %v1529_v42 = vld [vmem:[%s2992_s7 + $0x130] sm:$0xff] }
 0x247   :  { %v2525_v46 = vsub.f32 %v863_v52, %v1304_v45  ;;  %v2527_v47 = vsub.f32 %v865_v53, %v1304_v45  ;;  %v2529_v48 = vsub.f32 %v1005_v63, %v1304_v45  ;;  %v2531_v8 = vsub.f32 %v1007_v5, %v1304_v45  ;;  %v1538_v63 = vld [vmem:[%s2992_s7 + $0x178] sm:$0xff]  ;;  %v1520_v5 = vld [vmem:[%s2992_s7 + $0xe8] sm:$0xff] }
 0x248   :  { %1989 = vmatpush3.msra.mxu1 %v1538_v63  ;;  %1957 = vmatprep.subr.mxu0 %v1520_v5  ;;  %v1512_v45 = vld [vmem:[%s2992_s7 + $0xa8] sm:$0xff]  ;;  %v1525_v63 = vld [vmem:[%s2992_s7 + $0x110] sm:$0xff]  ;;  %v1507_v5 = vld [vmem:[%s2992_s7 + $0x80] sm:$0xff] }
 0x249   :  { %v1309_v49 = vmul.f32 %v2525_v46, %v2525_v46  ;;  %v1310_v50 = vmul.f32 %v2527_v47, %v2527_v47  ;;  %v1311_v11 = vmul.f32 %v2529_v48, %v2529_v48  ;;  %v1312_v3 = vmul.f32 %v2531_v8, %v2531_v8  ;;  %1990 = vmatprep.subr.mxu1 %v1553_v1  ;;  %v1540_v1 = vld [vmem:[%s2992_s7 + $0x188] sm:$0xff] }
 0x24a   :  { %1991 = vmatpush3.msra.mxu1 %v1537_v4  ;;  %1958 = vmatpush3.msra.mxu0 %v1504_v7  ;;  %v1524_v4 = vld [vmem:[%s2992_s7 + $0x108] sm:$0xff]  ;;  %v1491_v7 = vld [vmem:[%s2992_s7] sm:$0xff] }
 0x24b   :  { %v1313_v52 = vsel %vm1293_vm0, %v1309_v49, 0.0  ;;  %v1314_v53 = vsel %vm1293_vm0, %v1310_v50, 0.0  ;;  %v1316_v55 = vsel %vm1293_vm0, %v1311_v11, 0.0  ;;  %v1318_v57 = vsel %vm1293_vm0, %v1312_v3, 0.0  ;;  %1992 = vmatprep.subr.mxu1 %v1552_v6  ;;  %1959 = vmatprep.subr.mxu0 %v1519_v10  ;;  %v1544_v49 = vld [vmem:[%s2992_s7 + $0x1a8] sm:$0xff]  ;;  %v1511_v3 = vld [vmem:[%s2992_s7 + $0xa0] sm:$0xff] }
 0x24c   :  { %v1315_v54 = vadd.f32 %v1314_v53, %v1313_v52  ;;  %1993 = vmatpush3.msra.mxu1 %v1536_v9  ;;  %1960 = vmatpush3.msra.mxu0 %v1503_v13  ;;  %v1496_v50 = vld [vmem:[%s2992_s7 + $0x28] sm:$0xff]  ;;  %v1543_v52 = vld [vmem:[%s2992_s7 + $0x1a0] sm:$0xff]  ;;  %v1737_v10 = vld [vmem:[%s2994_s9 + $0xf8] sm:$0xff] }
 0x24d   :  { %1994 = vmatprep.subr.mxu1 %v1551_v12  ;;  %1961 = vmatprep.subr.mxu0 %v1518_v15  ;;  %v1528_v11 = vld [vmem:[%s2992_s7 + $0x128] sm:$0xff]  ;;  %v1495_v53 = vld [vmem:[%s2992_s7 + $0x20] sm:$0xff]  ;;  %v1769_v12 = vld [vmem:[%s2994_s9 + $0x1f8] sm:$0xff] }
 0x24e   :  { %v1317_v56 = vadd.f32 %v1316_v55, %v1315_v54  ;;  %1995 = vmatpush3.msra.mxu1 %v1535_v14  ;;  %1962 = vmatpush3.msra.mxu0 %v1502_v17  ;;  %v1527_v54 = vld [vmem:[%s2992_s7 + $0x120] sm:$0xff]  ;;  %v1510_v55 = vld [vmem:[%s2992_s7 + $0x98] sm:$0xff] }
 0x24f   :  { %1996 = vmatprep.subr.mxu1 %v1550_v16  ;;  %1963 = vmatprep.subr.mxu0 %v1517_v19  ;;  %v1539_v6 = vld [vmem:[%s2992_s7 + $0x180] sm:$0xff] }
 0x250   :  { %v1319_v58 = vadd.f32 %v1318_v57, %v1317_v56  ;;  %1997 = vmatpush3.msra.mxu1 %v1534_v18  ;;  %1964 = vmatpush3.msra.mxu0 %v1501_v21  ;;  %v1542_v56 = vld [vmem:[%s2992_s7 + $0x198] sm:$0xff]  ;;  %v1523_v9 = vld [vmem:[%s2992_s7 + $0x100] sm:$0xff] }
 0x251   :  { %1998 = vmatprep.subr.mxu1 %v1549_v20  ;;  %1965 = vmatprep.subr.mxu0 %v1516_v25  ;;  %v1494_v57 = vld [vmem:[%s2992_s7 + $0x18] sm:$0xff] }
 0x252   :  { %1320 = vadd.xlane.f32.xlu1 %v1319_v58  ;;  %1999 = vmatpush3.msra.mxu1 %v1533_v22  ;;  %v1526_v58 = vld [vmem:[%s2992_s7 + $0x118] sm:$0xff] }
 0x253   :  { %2000 = vmatprep.subr.mxu1 %v1548_v26  ;;  %1966 = vmatpush3.msra.mxu0 %v1500_v27 }
 0x254   :  { %2001 = vmatpush3.msra.mxu1 %v1532_v28  ;;  %1967 = vmatprep.subr.mxu0 %v1515_v29 }
 0x255   :  { %2002 = vmatprep.subr.mxu1 %v1547_v30  ;;  %1968 = vmatpush3.msra.mxu0 %v1499_v31  ;;  %v1329_v31 = vld [vmem:[#allocation8] sm:$0xf] }
 0x256   :  { %2003 = vmatpush3.msra.mxu1 %v1531_v32  ;;  %1969 = vmatprep.subr.mxu0 %v1514_v34  ;;  %v1355_v32 = vld [vmem:[#allocation10] sm:$0xf]  ;;  %v1338_v34 = vrot.slane %v1329_v31, %v2489_v44 }
 0x257   :  { %2004 = vmatprep.subr.mxu1 %v1546_v41  ;;  %1970 = vmatpush3.msra.mxu0 %v1498_v35  ;;  %v1346_v41 = vrot.slane %v1329_v31, %v2497_v51  ;;  %v1334_v35 = vrot.slane %v1329_v31, %v2486_v43 }
 0x258   :  { %2005 = vmatpush3.msra.mxu1 %v1530_v36  ;;  %1971 = vmatprep.subr.mxu0 %v1513_v38  ;;  %v1342_v36 = vrot.slane %v1329_v31, %v2494_v62  ;;  %v1747_v31 = vld [vmem:[%s2994_s9 + $0x148] sm:$0xff] }
 0x259   :  { %2006 = vmatprep.subr.mxu1 %v1545_v39  ;;  %1972 = vmatpush3.msra.mxu0 %v1497_v40  ;;  %v1364_v39 = vrot.slane %v1355_v32, %v2489_v44  ;;  %v1372_v40 = vrot.slane %v1355_v32, %v2497_v51 }
 0x25a   :  { %2007 = vmatpush3.msra.mxu1 %v1529_v42  ;;  %1973 = vmatprep.subr.mxu0 %v1512_v45  ;;  %v1360_v42 = vrot.slane %v1355_v32, %v2486_v43  ;;  %v1368_v45 = vrot.slane %v1355_v32, %v2494_v62  ;;  %v1730_v32 = vld [vmem:[%s2994_s9 + $0xc0] sm:$0xff] }
 0x25b   :  { %2008 = vmatprep.subr.mxu1 %v1544_v49  ;;  %1974 = vmatpush3.msra.mxu0 %v1496_v50 }
 0x25c   :  { %2009 = vmatpush3.msra.mxu1 %v1528_v11  ;;  %1975 = vmatprep.subr.mxu0 %v1511_v3 }
 0x25d   :  { %2010 = vmatprep.subr.mxu1 %v1543_v52  ;;  %1976 = vmatpush3.msra.mxu0 %v1495_v53 }
 0x25e   :  { %2011 = vmatpush3.msra.mxu1 %v1527_v54  ;;  %1977 = vmatprep.subr.mxu0 %v1510_v55 }
 0x25f   :  { %2012 = vmatprep.subr.mxu1 %v1542_v56  ;;  %1978 = vmatpush3.msra.mxu0 %v1494_v57 }
 0x260   :  { %2013 = vmatpush3.msra.mxu1 %v1526_v58  ;;  %1979 = vmatprep.subr.mxu0 %v1509_v59 }
 0x261   :  { %2014 = vmatprep.subr.mxu1 %v1541_v60  ;;  %1980 = vmatpush3.msra.mxu0 %v1493_v61 }
 0x262   :  { %2015 = vmatpush3.msra.mxu1 %v1525_v63  ;;  %1981 = vmatprep.subr.mxu0 %v1508_v0  ;;  %v1753_v0 = vld [vmem:[%s2994_s9 + $0x178] sm:$0xff] }
 0x263   :  { %2016 = vmatprep.subr.mxu1 %v1540_v1  ;;  %1982 = vmatpush3.msra.mxu0 %v1492_v2 }
 0x264   :  { %2017 = vmatpush3.msra.mxu1 %v1524_v4  ;;  %1983 = vmatprep.subr.mxu0 %v1507_v5  ;;  %v1736_v4 = vld [vmem:[%s2994_s9 + $0xf0] sm:$0xff] }
 0x265   :  { %2018 = vmatprep.subr.mxu1 %v1539_v6  ;;  %1984 = vmatpush3.msra.mxu0 %v1491_v7  ;;  %v1768_v5 = vld [vmem:[%s2994_s9 + $0x1f0] sm:$0xff] }
 0x266   :  { %2019 = vmatpush3.msra.mxu1 %v1523_v9  ;;  %2023 = vmatprep.subr.mxu0 %v1737_v10  ;;  %v1720_v6 = vld [vmem:[%s2994_s9 + $0x70] sm:$0xff]  ;;  %v1735_v9 = vld [vmem:[%s2994_s9 + $0xe8] sm:$0xff] }
 0x267   :  { %2058 = vmatprep.subr.mxu1 %v1769_v12  ;;  %v1752_v7 = vld [vmem:[%s2994_s9 + $0x170] sm:$0xff]  ;;  %v1767_v10 = vld [vmem:[%s2994_s9 + $0x1e8] sm:$0xff] }
 0x268   :  { %v1719_v12 = vld [vmem:[%s2994_s9 + $0x68] sm:$0xff] }
 0x2c8   :  { %v1401_v13 = vpop.xlane.xlu0 %1400 }
 0x2c9   :  { %v1402_v14 = vmul.f32 0.001953125, %v1401_v13  ;;  %v1751_v13 = vld [vmem:[%s2994_s9 + $0x168] sm:$0xff] }
 0x2cb   :  { %v2744_v15 = vsub.f32 %v2509_v23, %v1402_v14  ;;  %v2747_v16 = vsub.f32 %v2511_v24, %v1402_v14  ;;  %v2750_v17 = vsub.f32 %v2517_v33, %v1402_v14  ;;  %v2753_v18 = vsub.f32 %v2521_v37, %v1402_v14  ;;  %v1734_v14 = vld [vmem:[%s2994_s9 + $0xe0] sm:$0xff] }
 0x2cd   :  { %v1407_v19 = vmul.f32 %v2744_v15, %v2744_v15  ;;  %v1408_v20 = vmul.f32 %v2747_v16, %v2747_v16  ;;  %v1409_v21 = vmul.f32 %v2750_v17, %v2750_v17  ;;  %v1410_v23 = vmul.f32 %v2753_v18, %v2753_v18 }
 0x2cf   :  { %v1411_v24 = vsel %vm1293_vm0, %v1407_v19, 0.0  ;;  %v1412_v33 = vsel %vm1293_vm0, %v1408_v20, 0.0  ;;  %v1414_v37 = vsel %vm1293_vm0, %v1409_v21, 0.0  ;;  %v1416_v26 = vsel %vm1293_vm0, %v1410_v23, 0.0  ;;  %v1766_v19 = vld [vmem:[%s2994_s9 + $0x1e0] sm:$0xff]  ;;  %v1733_v23 = vld [vmem:[%s2994_s9 + $0xd8] sm:$0xff] }
 0x2d0   :  { %v1413_v22 = vadd.f32 %v1412_v33, %v1411_v24  ;;  %v1718_v20 = vld [vmem:[%s2994_s9 + $0x60] sm:$0xff]  ;;  %v1765_v24 = vld [vmem:[%s2994_s9 + $0x1d8] sm:$0xff] }
 0x2d1   :  { %v1750_v21 = vld [vmem:[%s2994_s9 + $0x160] sm:$0xff]  ;;  %v1717_v33 = vld [vmem:[%s2994_s9 + $0x58] sm:$0xff] }
 0x2d2   :  { %v1415_v25 = vadd.f32 %v1414_v37, %v1413_v22  ;;  %v1749_v22 = vld [vmem:[%s2994_s9 + $0x158] sm:$0xff]  ;;  %v1732_v37 = vld [vmem:[%s2994_s9 + $0xd0] sm:$0xff] }
 0x2d4   :  { %v1417_v27 = vadd.f32 %v1416_v26, %v1415_v25  ;;  %v1764_v25 = vld [vmem:[%s2994_s9 + $0x1d0] sm:$0xff] }
 0x2d5   :  { %v1716_v26 = vld [vmem:[%s2994_s9 + $0x50] sm:$0xff] }
 0x2d6   :  { %1418 = vadd.xlane.f32.xlu1 %v1417_v27  ;;  %v1748_v27 = vld [vmem:[%s2994_s9 + $0x150] sm:$0xff] }
 0x2db   :  { %v1321_v28 = vpop.xlane.xlu1 %1320 }
 0x2dc   :  { %v1322_v29 = vmul.f32 0.001953125, %v1321_v28  ;;  %v1731_v28 = vld [vmem:[%s2994_s9 + $0xc8] sm:$0xff] }
 0x2de   :  { %v1323_v30 = vadd.f32 1e-05, %v1322_v29  ;;  %v1763_v29 = vld [vmem:[%s2994_s9 + $0x1c8] sm:$0xff] }
 0x2e0   :  { %2108 = vrsqrt.f32 %v1323_v30  ;;  %v1715_v30 = vld [vmem:[%s2994_s9 + $0x48] sm:$0xff] }
 0x2ed   :  { %v2109_v38 = vpop.eup %2108 }
 0x2ee   :  { %v1326_v49 = vmul.f32 %v2109_v38, %v2527_v47  ;;  %v1328_v50 = vmul.f32 %v2109_v38, %v2531_v8  ;;  %v1325_v11 = vmul.f32 %v2109_v38, %v2525_v46  ;;  %v1327_v3 = vmul.f32 %v2109_v38, %v2529_v48  ;;  %v1721_v48 = vld [vmem:[%s2994_s9 + $0x78] sm:$0xff] }
 0x2ef   :  { %v1761_v38 = vld [vmem:[%s2994_s9 + $0x1b8] sm:$0xff] }
 0x2f0   :  { %v1352_v52 = vmul.f32 %v1338_v34, %v1326_v49  ;;  %v1354_v53 = vmul.f32 %v1346_v41, %v1328_v50  ;;  %v1351_v54 = vmul.f32 %v1334_v35, %v1325_v11  ;;  %v1353_v55 = vmul.f32 %v1342_v36, %v1327_v3  ;;  %v1762_v34 = vld [vmem:[%s2994_s9 + $0x1c0] sm:$0xff]  ;;  %v1729_v36 = vld [vmem:[%s2994_s9 + $0xb8] sm:$0xff]  ;;  %v1712_v49 = vld [vmem:[%s2994_s9 + $0x30] sm:$0xff] }
 0x2f1   :  { %v1714_v41 = vld [vmem:[%s2994_s9 + $0x40] sm:$0xff]  ;;  %v1744_v50 = vld [vmem:[%s2994_s9 + $0x130] sm:$0xff]  ;;  %v1727_v11 = vld [vmem:[%s2994_s9 + $0xa8] sm:$0xff] }
 0x2f2   :  { %v1378_v56 = vadd.f32 %v1364_v39, %v1352_v52  ;;  %v1380_v57 = vadd.f32 %v1372_v40, %v1354_v53  ;;  %v1377_v58 = vadd.f32 %v1360_v42, %v1351_v54  ;;  %v1379_v59 = vadd.f32 %v1368_v45, %v1353_v55  ;;  %v1746_v35 = vld [vmem:[%s2994_s9 + $0x140] sm:$0xff]  ;;  %v1713_v39 = vld [vmem:[%s2994_s9 + $0x38] sm:$0xff]  ;;  %v1728_v42 = vld [vmem:[%s2994_s9 + $0xb0] sm:$0xff] }
 0x2f3   :  { %v1745_v40 = vld [vmem:[%s2994_s9 + $0x138] sm:$0xff]  ;;  %v1760_v45 = vld [vmem:[%s2994_s9 + $0x1b0] sm:$0xff]  ;;  %v1759_v3 = vld [vmem:[%s2994_s9 + $0x1a8] sm:$0xff] }
 0x2f4   :  { %vm1382_vm1 = vcmp.ge.f32.partialorder %v1378_v56, 0.0  ;;  %v1386_v60 = vmul.f32 0.01, %v1378_v56  ;;  %vm1384_vm2 = vcmp.ge.f32.partialorder %v1380_v57, 0.0  ;;  %v1388_v61 = vmul.f32 0.01, %v1380_v57 }
 0x2f5   :  { %vm1381_vm3 = vcmp.ge.f32.partialorder %v1377_v58, 0.0  ;;  %v1385_v47 = vmul.f32 0.01, %v1377_v58  ;;  %vm1383_vm4 = vcmp.ge.f32.partialorder %v1379_v59, 0.0  ;;  %v1387_v8 = vmul.f32 0.01, %v1379_v59 }
 0x2f6   :  { %v1390_v63 = vsel %vm1382_vm1, %v1378_v56, %v1386_v60  ;;  %v1392_v46 = vsel %vm1384_vm2, %v1380_v57, %v1388_v61  ;;  %v1711_v52 = vld [vmem:[%s2994_s9 + $0x28] sm:$0xff]  ;;  %v1726_v54 = vld [vmem:[%s2994_s9 + $0xa0] sm:$0xff]  ;;  %v1709_v60 = vld [vmem:[%s2994_s9 + $0x18] sm:$0xff] }
 0x2f7   :  { %1626 = vmatprep.mubr.f32.mxu0 %v1390_v63  ;;  %1696 = vmatprep.mubr.f32.mxu1 %v1392_v46  ;;  %v1389_v1 = vsel %vm1381_vm3, %v1377_v58, %v1385_v47  ;;  %v1391_v2 = vsel %vm1383_vm4, %v1379_v59, %v1387_v8  ;;  %v1743_v53 = vld [vmem:[%s2994_s9 + $0x128] sm:$0xff]  ;;  %v1758_v55 = vld [vmem:[%s2994_s9 + $0x1a0] sm:$0xff]  ;;  %v1725_v58 = vld [vmem:[%s2994_s9 + $0x98] sm:$0xff] }
 0x2f8   :  { %1627 = vmatmul.mubr.f32.vlgmr.msra.gmra.mxu0 %v1389_v1  ;;  %1697 = vmatmul.mubr.f32.vlgmr.msra.gmra.mxu1 %v1391_v2  ;;  %v1710_v56 = vld [vmem:[%s2994_s9 + $0x20] sm:$0xff]  ;;  %v1757_v59 = vld [vmem:[%s2994_s9 + $0x198] sm:$0xff]  ;;  %v1724_v47 = vld [vmem:[%s2994_s9 + $0x90] sm:$0xff] }
 0x2f9   :  { %2024 = vmatpush3.msra.mxu0 %v1721_v48  ;;  %2059 = vmatpush3.msra.mxu1 %v1753_v0  ;;  %v1742_v57 = vld [vmem:[%s2994_s9 + $0x120] sm:$0xff]  ;;  %v1741_v61 = vld [vmem:[%s2994_s9 + $0x118] sm:$0xff]  ;;  %v1756_v8 = vld [vmem:[%s2994_s9 + $0x190] sm:$0xff] }
 0x2fa   :  { %2025 = vmatprep.subr.mxu0 %v1736_v4  ;;  %2060 = vmatprep.subr.mxu1 %v1768_v5  ;;  %v1708_v63 = vld [vmem:[%s2994_s9 + $0x10] sm:$0xff]  ;;  %v1723_v48 = vld [vmem:[%s2994_s9 + $0x88] sm:$0xff]  ;;  %v1722_v4 = vld [vmem:[%s2994_s9 + $0x80] sm:$0xff] }
 0x2fb   :  { %2026 = vmatpush3.msra.mxu0 %v1720_v6  ;;  %2061 = vmatpush3.msra.mxu1 %v1752_v7  ;;  %v1740_v46 = vld [vmem:[%s2994_s9 + $0x110] sm:$0xff]  ;;  %v1755_v0 = vld [vmem:[%s2994_s9 + $0x188] sm:$0xff]  ;;  %v1754_v5 = vld [vmem:[%s2994_s9 + $0x180] sm:$0xff] }
 0x2fc   :  { %2027 = vmatprep.subr.mxu0 %v1735_v9  ;;  %2062 = vmatprep.subr.mxu1 %v1767_v10  ;;  %v1707_v1 = vld [vmem:[%s2994_s9 + $0x8] sm:$0xff]  ;;  %v1706_v6 = vld [vmem:[%s2994_s9] sm:$0xff] }
 0x2fd   :  { %2028 = vmatpush3.msra.mxu0 %v1719_v12  ;;  %2063 = vmatpush3.msra.mxu1 %v1751_v13  ;;  %v1739_v2 = vld [vmem:[%s2994_s9 + $0x108] sm:$0xff]  ;;  %v1738_v7 = vld [vmem:[%s2994_s9 + $0x100] sm:$0xff]  ;;  %v1427_v13 = vld [vmem:[#allocation11] sm:$0xf]  ;;  %s2360_s9 = smov [#allocation17]  }
 0x2fe   :  { %2029 = vmatprep.subr.mxu0 %v1734_v14  ;;  %2064 = vmatprep.subr.mxu1 %v1766_v19  ;;  %v1453_v14 = vld [vmem:[#allocation13] sm:$0xf]  ;;  %v1436_v19 = vrot.slane %v1427_v13, %v2489_v44  ;;  %s1924_s30 = sshll.u32 %s2360_s9, 4  ;;  %s1925_s30 = int_to_ptr.vmem [resolvable:$true] %s1924_s30 }
 0x2ff   :  { %2030 = vmatpush3.msra.mxu0 %v1718_v20  ;;  %2065 = vmatpush3.msra.mxu1 %v1750_v21  ;;  %v1444_v20 = vrot.slane %v1427_v13, %v2497_v51  ;;  %v1432_v21 = vrot.slane %v1427_v13, %v2486_v43  ;;  %s2294_s13 = scalar_lea.vmem %s1925_s30, 32  ;;  %p2299_p4 = scmp.lt.s32.totalorder %s1925_s30, %s1925_s30 }
 0x300   :  { %2031 = vmatprep.subr.mxu0 %v1733_v23  ;;  %2066 = vmatprep.subr.mxu1 %v1765_v24  ;;  %v1440_v23 = vrot.slane %v1427_v13, %v2494_v62  ;;  %p2295_p3 = scmp.ne.s32.totalorder %s1925_s30, %s2294_s13  ;;  %p2300_p5 = scmp.lt.s32.totalorder %s2294_s13, %s2294_s13 }
 0x301   :  { %2032 = vmatpush3.msra.mxu0 %v1717_v33  ;;  %2067 = vmatpush3.msra.mxu1 %v1749_v22  ;;  %v1462_v33 = vrot.slane %v1453_v14, %v2489_v44  ;;  %v1470_v22 = vrot.slane %v1453_v14, %v2497_v51 }
 0x302   :  { %2033 = vmatprep.subr.mxu0 %v1732_v37  ;;  %2068 = vmatprep.subr.mxu1 %v1764_v25  ;;  %v1458_v37 = vrot.slane %v1453_v14, %v2486_v43  ;;  %v1466_v25 = vrot.slane %v1453_v14, %v2494_v62  ;;  %p2301_p6 = por %p2300_p5, %p2299_p4 }
 0x303   :  { %2034 = vmatpush3.msra.mxu0 %v1716_v26  ;;  %2069 = vmatpush3.msra.mxu1 %v1748_v27 }
 0x304   :  { %2035 = vmatprep.subr.mxu0 %v1731_v28  ;;  %2070 = vmatprep.subr.mxu1 %v1763_v29  ;;  %p2302_p7 = pnand %p2301_p6, %p2295_p3 }
 0x305   :  { %2036 = vmatpush3.msra.mxu0 %v1715_v30  ;;  %2071 = vmatpush3.msra.mxu1 %v1747_v31 }
 0x306   :  { %2037 = vmatprep.subr.mxu0 %v1730_v32  ;;  %2072 = vmatprep.subr.mxu1 %v1762_v34 }
 0x307   :  { %2038 = vmatpush3.msra.mxu0 %v1714_v41  ;;  %2073 = vmatpush3.msra.mxu1 %v1746_v35 }
 0x308   :  { %2039 = vmatprep.subr.mxu0 %v1729_v36  ;;  %2074 = vmatprep.subr.mxu1 %v1761_v38 }
 0x309   :  { %2040 = vmatpush3.msra.mxu0 %v1713_v39  ;;  %2075 = vmatpush3.msra.mxu1 %v1745_v40 }
 0x30a   :  { %2041 = vmatprep.subr.mxu0 %v1728_v42  ;;  %2076 = vmatprep.subr.mxu1 %v1760_v45  ;;  %v1951_v42 = vld [vmem:[#allocation14] ss:$0 sm:$0xff] }
 0x30b   :  { %2042 = vmatpush3.msra.mxu0 %v1712_v49  ;;  %2077 = vmatpush3.msra.mxu1 %v1744_v50 }
 0x30c   :  { %2043 = vmatprep.subr.mxu0 %v1727_v11  ;;  %2078 = vmatprep.subr.mxu1 %v1759_v3 }
 0x30d   :  { %2044 = vmatpush3.msra.mxu0 %v1711_v52  ;;  %2079 = vmatpush3.msra.mxu1 %v1743_v53 }
 0x30e   :  { %2045 = vmatprep.subr.mxu0 %v1726_v54  ;;  %2080 = vmatprep.subr.mxu1 %v1758_v55 }
 0x30f   :  { %2046 = vmatpush3.msra.mxu0 %v1710_v56  ;;  %2081 = vmatpush3.msra.mxu1 %v1742_v57 }
 0x310   :  { %2047 = vmatprep.subr.mxu0 %v1725_v58  ;;  %2082 = vmatprep.subr.mxu1 %v1757_v59 }
 0x311   :  { %2048 = vmatpush3.msra.mxu0 %v1709_v60  ;;  %2083 = vmatpush3.msra.mxu1 %v1741_v61 }
 0x312   :  { %2049 = vmatprep.subr.mxu0 %v1724_v47  ;;  %2084 = vmatprep.subr.mxu1 %v1756_v8 }
 0x313   :  { %2050 = vmatpush3.msra.mxu0 %v1708_v63  ;;  %2085 = vmatpush3.msra.mxu1 %v1740_v46 }
 0x314   :  { %2051 = vmatprep.subr.mxu0 %v1723_v48  ;;  %2086 = vmatprep.subr.mxu1 %v1755_v0 }
 0x315   :  { %2052 = vmatpush3.msra.mxu0 %v1707_v1  ;;  %2087 = vmatpush3.msra.mxu1 %v1739_v2 }
 0x316   :  { %2053 = vmatprep.subr.mxu0 %v1722_v4  ;;  %2088 = vmatprep.subr.mxu1 %v1754_v5 }
 0x317   :  { %2054 = vmatpush3.msra.mxu0 %v1706_v6  ;;  %2089 = vmatpush3.msra.mxu1 %v1738_v7 }
 0x35f   :  { %v1419_v9 = vpop.xlane.xlu1 %1418 }
 0x360   :  { %v1420_v10 = vmul.f32 0.001953125, %v1419_v9 }
 0x362   :  { %v1421_v12 = vadd.f32 1e-05, %v1420_v10 }
 0x364   :  { %2110 = vrsqrt.f32 %v1421_v12 }
 0x371   :  { %v2111_v24 = vpop.eup %2110 }
 0x372   :  { %v1424_v26 = vmul.f32 %v2111_v24, %v2747_v16  ;;  %v1426_v27 = vmul.f32 %v2111_v24, %v2753_v18  ;;  %v1423_v28 = vmul.f32 %v2111_v24, %v2744_v15  ;;  %v1425_v29 = vmul.f32 %v2111_v24, %v2750_v17 }
 0x374   :  { %v1450_v30 = vmul.f32 %v1436_v19, %v1424_v26  ;;  %v1452_v31 = vmul.f32 %v1444_v20, %v1426_v27  ;;  %v1449_v32 = vmul.f32 %v1432_v21, %v1423_v28  ;;  %v1451_v34 = vmul.f32 %v1440_v23, %v1425_v29 }
 0x376   :  { %v1476_v41 = vadd.f32 %v1462_v33, %v1450_v30  ;;  %v1478_v44 = vadd.f32 %v1470_v22, %v1452_v31  ;;  %v1475_v35 = vadd.f32 %v1458_v37, %v1449_v32  ;;  %v1477_v51 = vadd.f32 %v1466_v25, %v1451_v34 }
 0x378   :  { %vm1480_vm5 = vcmp.ge.f32.partialorder %v1476_v41, 0.0  ;;  %v1484_v43 = vmul.f32 0.01, %v1476_v41  ;;  %vm1482_vm6 = vcmp.ge.f32.partialorder %v1478_v44, 0.0  ;;  %v1486_v62 = vmul.f32 0.01, %v1478_v44 }
 0x379   :  { %vm1479_vm7 = vcmp.ge.f32.partialorder %v1475_v35, 0.0  ;;  %v1483_v16 = vmul.f32 0.01, %v1475_v35  ;;  %vm1481_vm8 = vcmp.ge.f32.partialorder %v1477_v51, 0.0  ;;  %v1485_v18 = vmul.f32 0.01, %v1477_v51 }
 0x37a   :  { %v1488_v36 = vsel %vm1480_vm5, %v1476_v41, %v1484_v43  ;;  %v1490_v15 = vsel %vm1482_vm6, %v1478_v44, %v1486_v62 }
 0x37b   :  { %1841 = vmatprep.mubr.f32.mxu0 %v1488_v36  ;;  %1911 = vmatprep.mubr.f32.mxu1 %v1490_v15  ;;  %v1487_v17 = vsel %vm1479_vm7, %v1475_v35, %v1483_v16  ;;  %v1489_v38 = vsel %vm1481_vm8, %v1477_v51, %v1485_v18 }
 0x37c   :  { %1842 = vmatmul.mubr.f32.vlgmr.msra.gmra.mxu0 %v1487_v17  ;;  %1912 = vmatmul.mubr.f32.vlgmr.msra.gmra.mxu1 %v1489_v38 }
 0x3b8   :  { %v1985_v39 = vpop.f32.mrf.mxu0  ;;  %v2020_v40 = vpop.f32.mrf.mxu1 }
 0x3ba   :  { %v1986_v45 = vpop.f32.mrf.mxu0  ;;  %v2021_v49 = vpop.f32.mrf.mxu1 }
 0x3bb   :  { %v1987_v50 = vadd.f32 %v1986_v45, %v1985_v39  ;;  %v2022_v3 = vadd.f32 %v2021_v49, %v2020_v40 }
 0x3bd   :  { %v1629_v11 = vadd.f32 %v1987_v50, %v1951_v42 }
 0x3bf   :  { %v1699_v52 = vadd.f32 %v2022_v3, %v1629_v11 }
 0x3c1   :  { %v1702_v53 = vmul.f32 1.442695, %v1699_v52 }
 0x3c3   :  { %2112 = vpow2.f32 %v1702_v53 }
 0x3d0   :  { %v2113_v54 = vpop.eup %2112 }
 0x3d1   :  { %1705 = vst.msk [vmem:[#allocation17] sm:$0x3] %vm1704_vm9, %v2113_v54 }
 0x3d2   :  { %2305 = shalt.err (!%p2302_p7)
}
 0x3d3   :  { %1927 = dma.vmem_to_hbm [thread:$0]  %s1925_s30, 32, %s2996_s11, [#allocation4]   ;;  %v1952_v57 = vld [vmem:[#allocation16] ss:$0 sm:$0xff] }
 0x3d4   :  { %s2361_s15 = smov [#allocation18]  }
 0x3d5   :  { %s1934_s16 = sshll.u32 %s2361_s15, 4  ;;  %s1935_s16 = int_to_ptr.vmem [resolvable:$true] %s1934_s16 }
 0x3d6   :  { %s2314_s0 = scalar_lea.vmem %s1935_s16, 32  ;;  %p2319_p9 = scmp.lt.s32.totalorder %s1935_s16, %s1935_s16 }
 0x3d7   :  { %p2315_p8 = scmp.ne.s32.totalorder %s1935_s16, %s2314_s0  ;;  %p2320_p10 = scmp.lt.s32.totalorder %s2314_s0, %s2314_s0 }
 0x3d9   :  { %p2321_p11 = por %p2320_p10, %p2319_p9 }
 0x3db   :  { %p2322_p12 = pnand %p2321_p11, %p2315_p8 }
 0x43c   :  { %v2055_v55 = vpop.f32.mrf.mxu0  ;;  %v2090_v56 = vpop.f32.mrf.mxu1 }
 0x43e   :  { %v2056_v58 = vpop.f32.mrf.mxu0  ;;  %v2091_v59 = vpop.f32.mrf.mxu1 }
 0x43f   :  { %v2057_v60 = vadd.f32 %v2056_v58, %v2055_v55  ;;  %v2092_v47 = vadd.f32 %v2091_v59, %v2090_v56 }
 0x441   :  { %v1844_v61 = vadd.f32 %v2057_v60, %v1952_v57 }
 0x443   :  { %v1914_v8 = vadd.f32 %v2092_v47, %v1844_v61 }
 0x445   :  { %1917 = vst.msk [vmem:[#allocation18] sm:$0x3] %vm1704_vm9, %v1914_v8 }
 0x446   :  { %2325 = shalt.err (!%p2322_p12)
}
 0x447   :  { %1937 = dma.vmem_to_hbm [thread:$0]  %s1935_s16, 32, %s2997_s12, [#allocation19]  }
 0x448   :  { %2344 = dma.done.wait [#allocation4], 32  }
 0x449   :  { %2345 = vsyncadd [#allocation4], 4294967264 }
 0x44a   :  { %2346 = dma.done.wait [#allocation19], 32  }
 0x44b   :  { %2347 = vsyncadd [#allocation19], 4294967264 }
 0x44c   :  { %1944 = vsyncpa [#allocation3], 1 }
 0x44d   :  { %1945 = vsyncpa [#allocation6], 1 }
 0x44e   :  { %1946 = vsyncpa [#allocation9], 1 }
 0x44f   :  { %1947 = vsyncpa [#allocation12], 1 }
 0x450   :  { %1948 = vsyncpa [#allocation15], 1 }
 0x451   :  { %1949 = vsyncpa [#allocation4], 1 }
 0x452   :  { %1950 = vsyncpa [#allocation19], 1 }

</bundles_post_ra>
